<compile_context>
chip_gen: v7x
topology: tpu7x:2x2x1
jax: 0.10.0
libtpu: 0.0.40
codegen_flags: <defaults>
</compile_context>

<pallas_src>
import jax
import jax.numpy as jnp
from jax.experimental import pallas as pl
from jax.experimental.pallas import tpu as pltpu

VOTE_C = 128          # vote_c in the module
OUT_DIM = 128         # forced equal to 128 by `seed_features.T + net[:, :, 4:]`
BN_EPS = 1e-5
NORM_EPS = 1e-12      # F.normalize eps
MAX_TILE_1TC = 1024   # point-tile bound, single-TensorCore chips (v5e/v6e)
MAX_TILE_2TC = 2048   # point-tile bound, dual-TensorCore chips (v7x)


def _vote_head_kernel(x_ref, w1_ref, b1_ref, w2_ref, b2_ref, w3_ref, b3_ref,
                      osmall_ref, ofeat_ref):
    x = x_ref[...]                                                      # (T, 128) f32
    xb = x.astype(jnp.bfloat16)                                         # MXU input only
    # conv1 + bn1 + relu (BN folded into w1/b1), f32 accumulation on the MXU
    h1 = jnp.maximum(
        jnp.dot(xb, w1_ref[...], preferred_element_type=jnp.float32) + b1_ref[...],
        0.0).astype(jnp.bfloat16)
    # conv2 + bn2 + relu
    h2 = jnp.maximum(
        jnp.dot(h1, w2_ref[...], preferred_element_type=jnp.float32) + b2_ref[...],
        0.0).astype(jnp.bfloat16)
    # fused conv3: cols 0:3 = offset, col 3 = score logit, cols 128:256 = feat residual
    out3 = jnp.dot(h2, w3_ref[...], preferred_element_type=jnp.float32) + b3_ref[...]

    # small output: raw lane-aligned prefix (offset | score logit | structural zeros);
    # vote_xyz and the sigmoid are computed in the wrapper on tiny tensors.
    osmall_ref[...] = out3[:, 0:8]

    # residual add with full-precision f32 seed features, then L2 normalize:
    # F.normalize(p=2): v / max(||v||, eps) == v * rsqrt(max(||v||^2, eps^2)) (EUP)
    vf = x + out3[:, 128:256]                                           # (T, 128) f32
    ss = jnp.sum(vf * vf, axis=-1, keepdims=True)
    inv = jax.lax.rsqrt(jnp.maximum(ss, NORM_EPS * NORM_EPS))
    ofeat_ref[...] = (vf * inv).astype(jnp.bfloat16)                    # bf16 store


def _fold_bn(w, b, gamma, beta, mean, var, eps=BN_EPS):
    """Fold inference-mode BatchNorm1d into a 1x1 Conv1d; return channels-last weight."""
    s = gamma / jnp.sqrt(var + eps)
    w_eff = (w * s[:, None]).T          # (in, out) for x @ w_eff
    b_eff = (b - mean) * s + beta
    return w_eff, b_eff[None, :]


def _fuse_conv3(w3, b3, c=VOTE_C):
    """Pack conv3 (3+1+128, 128) into a single (128, 256) weight + (1, 256) bias.

    cols 0:3 -> offset, col 3 -> score logit, cols 128:256 -> feature residual.
    """
    c3 = 2 * c
    wf = jnp.zeros((c, c3), jnp.float32)
    wf = wf.at[:, 0:3].set(w3[0:3].T)
    wf = wf.at[:, 3:4].set(w3[3:4].T)
    wf = wf.at[:, c:c + c].set(w3[4:4 + c].T)
    bf = jnp.zeros((1, c3), jnp.float32)
    bf = bf.at[0, 0:3].set(b3[0:3])
    bf = bf.at[0, 3:4].set(b3[3:4])
    bf = bf.at[0, c:].set(b3[4:])
    return wf, bf


def _num_tensorcores():
    """Dual-TC chips (v7x, and megacore v4/v5p) get grid sharding; v5e/v6e are 1 TC."""
    try:
        kind = jax.devices()[0].device_kind.lower()
    except Exception:
        return 1
    if "7" in kind or "v4" in kind or "v5p" in kind:
        return 2
    return 1


def _choose_tile(P, num_tc, max_tile):
    """Point-tile selection (no jnp.pad anywhere).

    - single TC and P <= max_tile: one full-array block (no grid-loop overhead)
    - otherwise prefer a multiple-of-16 tile that divides P exactly (clean bf16
      sublane layout, no partial block) and, on dual-TC chips, an even step count
    - fallback: multiple-of-16 tile with a masked partial last block
    """
    if num_tc <= 1 and P <= max_tile:
        return P, 1
    min_steps = 2 if num_tc > 1 else 1
    t = (min(max_tile, P) // 16) * 16
    while t >= 16:
        if P % t == 0:
            g = P // t
            if g >= min_steps and (num_tc <= 1 or g % num_tc == 0):
                return t, g
        t -= 16
    g_min = max(min_steps, pl.cdiv(P, max_tile))
    tile = min(max_tile, ((pl.cdiv(P, g_min) + 15) // 16) * 16)
    return tile, pl.cdiv(P, tile)


def candidate_vote_head(seed_xyz, seed_features, params):
    """seed_xyz: (B, N, 3) f32, seed_features: (B, N, 128) f32 (channels-last)."""
    B, N, C = seed_features.shape
    assert C == VOTE_C
    P = B * N

    # -- weight prep (plain JAX glue): fold BN, fuse conv3, cast weights to bf16 -----
    w1e, b1e = _fold_bn(params["conv1_w"], params["conv1_b"],
                        params["bn1_gamma"], params["bn1_beta"],
                        params["bn1_mean"], params["bn1_var"])
    w2e, b2e = _fold_bn(params["conv2_w"], params["conv2_b"],
                        params["bn2_gamma"], params["bn2_beta"],
                        params["bn2_mean"], params["bn2_var"])
    w3f, b3f = _fuse_conv3(params["conv3_w"], params["conv3_b"], C)
    w1b = w1e.astype(jnp.bfloat16)
    w2b = w2e.astype(jnp.bfloat16)
    w3b = w3f.astype(jnp.bfloat16)

    # -- activations: raw f32 features straight into the kernel, no pad / no cast ----
    x = seed_features.reshape(P, C)
    num_tc = _num_tensorcores()
    max_tile = MAX_TILE_2TC if num_tc > 1 else MAX_TILE_1TC
    tile, grid_n = _choose_tile(P, num_tc, max_tile)

    full = lambda a: pl.BlockSpec(a.shape, lambda i: (0,) * a.ndim)

    out_shapes = (
        jax.ShapeDtypeStruct((P, 8), jnp.float32),      # [offset(3) | logit(1) | 0s(4)]
        jax.ShapeDtypeStruct((P, C), jnp.bfloat16),     # normalized vote_features
    )
    out_specs = (
        pl.BlockSpec((tile, 8), lambda i: (i, 0)),
        pl.BlockSpec((tile, C), lambda i: (i, 0)),
    )
    in_specs = [
        pl.BlockSpec((tile, C), lambda i: (i, 0)),      # features (f32)
        full(w1b), full(b1e), full(w2b), full(b2e), full(w3b), full(b3f),
    ]

    # advisory cost estimate (per point: 3 matmuls on the MXU, one rsqrt)
    flops = P * (2 * C * C + 2 * C * C + 2 * C * (2 * C))
    transcendentals = P
    bytes_accessed = (P * C * 4                                   # f32 feature input
                      + P * (8 * 4 + C * 2)                       # outputs (small f32, feat bf16)
                      + 2 * C * C * 2 + C * (2 * C) * 2           # bf16 weights
                      + (2 * C + 2 * C) * 4)                      # f32 biases

    small, vfeat = pl.pallas_call(
        _vote_head_kernel,
        out_shape=out_shapes,
        grid=(grid_n,),
        in_specs=in_specs,
        out_specs=out_specs,
        compiler_params=pltpu.CompilerParams(
            dimension_semantics=("parallel",),
            vmem_limit_bytes=32 * 1024 * 1024),
        cost_estimate=pl.CostEstimate(flops=flops,
                                      transcendentals=transcendentals,
                                      bytes_accessed=bytes_accessed),
    )(x, w1b, b1e, w2b, b2e, w3b, b3f)

    # tiny (P, <=4) post-processing in the wrapper (negligible traffic)
    off = small[:, 0:3]
    vxyz = seed_xyz.reshape(P, 3) + off
    vsc = jax.nn.sigmoid(small[:, 3])

    return {
        "vote_xyz": jnp.squeeze(vxyz.reshape(B, N, 3)),
        "vote_xyz_offset": jnp.squeeze(off.reshape(B, N, 3)),
        "vote_scores": jnp.squeeze(vsc.reshape(B, N)),
        # bf16 (normalized, |v| <= 1); cast in the consumer if f32 is required
        "vote_features": jnp.squeeze(vfeat.reshape(B, N, C)),
    }


def _reference(seed_xyz, seed_features, params, use_bf16=False):
    """Pure-JAX reference of the voting head (same BN folding / conv3 split)."""
    B, N, C = seed_features.shape
    x = seed_features.reshape(B * N, C)
    xyz = seed_xyz.reshape(B * N, 3)
    w1e, b1e = _fold_bn(params["conv1_w"], params["conv1_b"],
                        params["bn1_gamma"], params["bn1_beta"],
                        params["bn1_mean"], params["bn1_var"])
    w2e, b2e = _fold_bn(params["conv2_w"], params["conv2_b"],
                        params["bn2_gamma"], params["bn2_beta"],
                        params["bn2_mean"], params["bn2_var"])
    w3 = params["conv3_w"].T
    b3 = params["conv3_b"][None, :]

    cast = (lambda a: a.astype(jnp.bfloat16)) if use_bf16 else (lambda a: a)
    dot = lambda a, b: jnp.dot(cast(a), cast(b), preferred_element_type=jnp.float32)

    h1 = jax.nn.relu(dot(x, w1e) + b1e)
    h2 = jax.nn.relu(dot(h1, w2e) + b2e)
    net = dot(h2, w3) + b3
    off = net[:, 0:3]
    vxyz = xyz + off
    sc = jax.nn.sigmoid(net[:, 3])
    vf = x + net[:, 4:]
    vf = vf / jnp.maximum(jnp.linalg.norm(vf, axis=-1, keepdims=True), NORM_EPS)
    return (jnp.squeeze(vxyz.reshape(B, N, 3)), jnp.squeeze(off.reshape(B, N, 3)),
            jnp.squeeze(sc.reshape(B, N)), jnp.squeeze(vf.reshape(B, N, C)))


def make_params(key):
    ks = jax.random.split(key, 6)
    c = VOTE_C
    c3 = 3 + 1 + OUT_DIM
    std = 1.0 / jnp.sqrt(jnp.float32(c))
    return {
        "conv1_w": jax.random.normal(ks[0], (c, c), jnp.float32) * std,
        "conv1_b": jax.random.normal(ks[1], (c,), jnp.float32) * 0.01,
        "conv2_w": jax.random.normal(ks[2], (c, c), jnp.float32) * std,
        "conv2_b": jax.random.normal(ks[3], (c,), jnp.float32) * 0.01,
        "conv3_w": jax.random.normal(ks[4], (c3, c), jnp.float32) * std,
        "conv3_b": jax.random.normal(ks[5], (c3,), jnp.float32) * 0.01,
        # BatchNorm1d default init / running stats (inference mode)
        "bn1_gamma": jnp.ones((c,), jnp.float32), "bn1_beta": jnp.zeros((c,), jnp.float32),
        "bn1_mean": jnp.zeros((c,), jnp.float32), "bn1_var": jnp.ones((c,), jnp.float32),
        "bn2_gamma": jnp.ones((c,), jnp.float32), "bn2_beta": jnp.zeros((c,), jnp.float32),
        "bn2_mean": jnp.zeros((c,), jnp.float32), "bn2_var": jnp.ones((c,), jnp.float32),
    }


if __name__ == "__main__":
    B, N = 2, 128
    key = jax.random.PRNGKey(0)
    k_xyz, k_feat, k_par = jax.random.split(key, 3)

    seed_xyz = jax.random.normal(k_xyz, (B, N, 3), jnp.float32)
    # stand-in for fp1 output (seed_features), channels-last (B, N, 128)
    seed_features = jax.random.normal(k_feat, (B, N, VOTE_C), jnp.float32)
    params = make_params(k_par)

    fwd = jax.jit(candidate_vote_head)
    out = fwd(seed_xyz, seed_features, params)
    out = jax.tree_util.tree_map(jax.block_until_ready, out)
    got = (out["vote_xyz"], out["vote_xyz_offset"], out["vote_scores"],
           out["vote_features"].astype(jnp.float32))

    # matched-precision reference (bf16 matmul inputs, f32 accumulation): tight check
    ref_bf16 = _reference(seed_xyz, seed_features, params, use_bf16=True)
    for g, w in zip(got, ref_bf16):
        assert g.shape == w.shape
        assert jnp.max(jnp.abs(g - w)) < 2e-2

    # pure-f32 reference (module semantics): loose check for bf16 compute error
    ref_f32 = _reference(seed_xyz, seed_features, params, use_bf16=False)
    for g, w in zip(got, ref_f32):
        assert g.shape == w.shape
        assert jnp.max(jnp.abs(g - w)) < 1e-1

    print("KERNEL_OK")
</pallas_src>

<mosaic_0001>
module attributes {stable_mosaic.version = 11 : i64} {
  func.func @_vote_head_kernel(%arg0: i32, %arg1: memref<256x128xf32, #tpu.memory_space<vmem>>, %arg2: memref<128x128xbf16, #tpu.memory_space<vmem>>, %arg3: memref<1x128xf32, #tpu.memory_space<vmem>>, %arg4: memref<128x128xbf16, #tpu.memory_space<vmem>>, %arg5: memref<1x128xf32, #tpu.memory_space<vmem>>, %arg6: memref<128x256xbf16, #tpu.memory_space<vmem>>, %arg7: memref<1x256xf32, #tpu.memory_space<vmem>>, %arg8: memref<256x8xf32, #tpu.memory_space<vmem>>, %arg9: memref<256x128xbf16, #tpu.memory_space<vmem>>) attributes {dimension_semantics = [#tpu.dimension_semantics<parallel>], iteration_bounds = array<i64: 1>, scalar_prefetch = 0 : i64, scratch_operands = 0 : i64, tpu.core_type = #tpu.core_type<tc>, window_params = [{transform_indices = @transform_0, window_bounds = array<i64: 256, 128>}, {pipeline_mode = #tpu.pipeline_mode<synchronous>, transform_indices = @transform_1, window_bounds = array<i64: 128, 128>}, {pipeline_mode = #tpu.pipeline_mode<synchronous>, transform_indices = @transform_2, window_bounds = array<i64: 1, 128>}, {pipeline_mode = #tpu.pipeline_mode<synchronous>, transform_indices = @transform_3, window_bounds = array<i64: 128, 128>}, {pipeline_mode = #tpu.pipeline_mode<synchronous>, transform_indices = @transform_4, window_bounds = array<i64: 1, 128>}, {pipeline_mode = #tpu.pipeline_mode<synchronous>, transform_indices = @transform_5, window_bounds = array<i64: 128, 256>}, {pipeline_mode = #tpu.pipeline_mode<synchronous>, transform_indices = @transform_6, window_bounds = array<i64: 1, 256>}, {transform_indices = @transform_7, window_bounds = array<i64: 256, 8>}, {transform_indices = @transform_8, window_bounds = array<i64: 256, 128>}]} {
    %c0 = arith.constant 0 : index
    %c0_0 = arith.constant 0 : index
    %0 = vector.load %arg1[%c0, %c0_0] : memref<256x128xf32, #tpu.memory_space<vmem>>, vector<256x128xf32>
    %1 = arith.truncf %0 : vector<256x128xf32> to vector<256x128xbf16>
    %c0_1 = arith.constant 0 : index
    %c0_2 = arith.constant 0 : index
    %2 = vector.load %arg2[%c0_1, %c0_2] : memref<128x128xbf16, #tpu.memory_space<vmem>>, vector<128x128xbf16>
    %cst = arith.constant dense<0.000000e+00> : vector<256x128xf32>
    %3 = tpu.matmul %1, %2, %cst {dimension_numbers = #tpu.dot_dimension_numbers<[1], [0], [0], [1], [0, 0, 1, 1], [], []>} : vector<256x128xbf16>, vector<128x128xbf16>, vector<256x128xf32> -> vector<256x128xf32>
    %c0_3 = arith.constant 0 : index
    %c0_4 = arith.constant 0 : index
    %4 = vector.load %arg3[%c0_3, %c0_4] : memref<1x128xf32, #tpu.memory_space<vmem>>, vector<1x128xf32>
    %5 = vector.broadcast %4 : vector<1x128xf32> to vector<256x128xf32>
    %6 = arith.addf %3, %5 : vector<256x128xf32>
    %cst_5 = arith.constant 0.000000e+00 : f32
    %7 = vector.broadcast %cst_5 : f32 to vector<256x128xf32>
    %8 = arith.maximumf %6, %7 : vector<256x128xf32>
    %9 = arith.truncf %8 : vector<256x128xf32> to vector<256x128xbf16>
    %c0_6 = arith.constant 0 : index
    %c0_7 = arith.constant 0 : index
    %10 = vector.load %arg4[%c0_6, %c0_7] : memref<128x128xbf16, #tpu.memory_space<vmem>>, vector<128x128xbf16>
    %cst_8 = arith.constant dense<0.000000e+00> : vector<256x128xf32>
    %11 = tpu.matmul %9, %10, %cst_8 {dimension_numbers = #tpu.dot_dimension_numbers<[1], [0], [0], [1], [0, 0, 1, 1], [], []>} : vector<256x128xbf16>, vector<128x128xbf16>, vector<256x128xf32> -> vector<256x128xf32>
    %c0_9 = arith.constant 0 : index
    %c0_10 = arith.constant 0 : index
    %12 = vector.load %arg5[%c0_9, %c0_10] : memref<1x128xf32, #tpu.memory_space<vmem>>, vector<1x128xf32>
    %13 = vector.broadcast %12 : vector<1x128xf32> to vector<256x128xf32>
    %14 = arith.addf %11, %13 : vector<256x128xf32>
    %cst_11 = arith.constant 0.000000e+00 : f32
    %15 = vector.broadcast %cst_11 : f32 to vector<256x128xf32>
    %16 = arith.maximumf %14, %15 : vector<256x128xf32>
    %17 = arith.truncf %16 : vector<256x128xf32> to vector<256x128xbf16>
    %c0_12 = arith.constant 0 : index
    %c0_13 = arith.constant 0 : index
    %18 = vector.load %arg6[%c0_12, %c0_13] : memref<128x256xbf16, #tpu.memory_space<vmem>>, vector<128x256xbf16>
    %cst_14 = arith.constant dense<0.000000e+00> : vector<256x256xf32>
    %19 = tpu.matmul %17, %18, %cst_14 {dimension_numbers = #tpu.dot_dimension_numbers<[1], [0], [0], [1], [0, 0, 1, 1], [], []>} : vector<256x128xbf16>, vector<128x256xbf16>, vector<256x256xf32> -> vector<256x256xf32>
    %c0_15 = arith.constant 0 : index
    %c0_16 = arith.constant 0 : index
    %20 = vector.load %arg7[%c0_15, %c0_16] : memref<1x256xf32, #tpu.memory_space<vmem>>, vector<1x256xf32>
    %21 = vector.broadcast %20 : vector<1x256xf32> to vector<256x256xf32>
    %22 = arith.addf %19, %21 : vector<256x256xf32>
    %23 = vector.extract_strided_slice %22 {offsets = [0, 0], sizes = [256, 8], strides = [1, 1]} : vector<256x256xf32> to vector<256x8xf32>
    %c0_17 = arith.constant 0 : index
    %c0_18 = arith.constant 0 : index
    %24 = vector.load %arg8[%c0_17, %c0_18] : memref<256x8xf32, #tpu.memory_space<vmem>>, vector<256x8xf32>
    tpu.vector_store %arg8[%c0_17, %c0_18], %23 {strides = array<i32>} : memref<256x8xf32, #tpu.memory_space<vmem>>, vector<256x8xf32>,
    %25 = vector.extract_strided_slice %22 {offsets = [0, 128], sizes = [256, 128], strides = [1, 1]} : vector<256x256xf32> to vector<256x128xf32>
    %26 = arith.addf %0, %25 : vector<256x128xf32>
    %27 = arith.mulf %26, %26 : vector<256x128xf32>
    %cst_19 = arith.constant dense<0.000000e+00> : vector<256xf32>
    %28 = vector.multi_reduction <add>, %27, %cst_19 [1] : vector<256x128xf32> to vector<256xf32>
    %29 = vector.shape_cast %28 : vector<256xf32> to vector<256x1xf32>
    %cst_20 = arith.constant 1.000000e-24 : f32
    %30 = vector.broadcast %cst_20 : f32 to vector<256x1xf32>
    %31 = arith.maximumf %29, %30 : vector<256x1xf32>
    %32 = math.rsqrt %31 : vector<256x1xf32>
    %33 = vector.broadcast %32 : vector<256x1xf32> to vector<256x128xf32>
    %34 = arith.mulf %26, %33 : vector<256x128xf32>
    %35 = arith.truncf %34 : vector<256x128xf32> to vector<256x128xbf16>
    %c0_21 = arith.constant 0 : index
    %c0_22 = arith.constant 0 : index
    %36 = vector.load %arg9[%c0_21, %c0_22] : memref<256x128xbf16, #tpu.memory_space<vmem>>, vector<256x128xbf16>
    tpu.vector_store %arg9[%c0_21, %c0_22], %35 {strides = array<i32>} : memref<256x128xbf16, #tpu.memory_space<vmem>>, vector<256x128xbf16>,
    return
  }
  func.func @transform_0(%arg0: i32) -> (i32, i32) {
    %c0_i32 = arith.constant 0 : i32
    %c0_i32_0 = arith.constant 0 : i32
    return %arg0, %c0_i32 : i32, i32
  }
  func.func @transform_1(%arg0: i32) -> (i32, i32) {
    %c0_i32 = arith.constant 0 : i32
    %c0_i32_0 = arith.constant 0 : i32
    %c0_i32_1 = arith.constant 0 : i32
    return %c0_i32, %c0_i32_0 : i32, i32
  }
  func.func @transform_2(%arg0: i32) -> (i32, i32) {
    %c0_i32 = arith.constant 0 : i32
    %c0_i32_0 = arith.constant 0 : i32
    %c0_i32_1 = arith.constant 0 : i32
    return %c0_i32, %c0_i32_0 : i32, i32
  }
  func.func @transform_3(%arg0: i32) -> (i32, i32) {
    %c0_i32 = arith.constant 0 : i32
    %c0_i32_0 = arith.constant 0 : i32
    %c0_i32_1 = arith.constant 0 : i32
    return %c0_i32, %c0_i32_0 : i32, i32
  }
  func.func @transform_4(%arg0: i32) -> (i32, i32) {
    %c0_i32 = arith.constant 0 : i32
    %c0_i32_0 = arith.constant 0 : i32
    %c0_i32_1 = arith.constant 0 : i32
    return %c0_i32, %c0_i32_0 : i32, i32
  }
  func.func @transform_5(%arg0: i32) -> (i32, i32) {
    %c0_i32 = arith.constant 0 : i32
    %c0_i32_0 = arith.constant 0 : i32
    %c0_i32_1 = arith.constant 0 : i32
    return %c0_i32, %c0_i32_0 : i32, i32
  }
  func.func @transform_6(%arg0: i32) -> (i32, i32) {
    %c0_i32 = arith.constant 0 : i32
    %c0_i32_0 = arith.constant 0 : i32
    %c0_i32_1 = arith.constant 0 : i32
    return %c0_i32, %c0_i32_0 : i32, i32
  }
  func.func @transform_7(%arg0: i32) -> (i32, i32) {
    %c0_i32 = arith.constant 0 : i32
    %c0_i32_0 = arith.constant 0 : i32
    return %arg0, %c0_i32 : i32, i32
  }
  func.func @transform_8(%arg0: i32) -> (i32, i32) {
    %c0_i32 = arith.constant 0 : i32
    %c0_i32_0 = arith.constant 0 : i32
    return %arg0, %c0_i32 : i32, i32
  }
}

</mosaic_0001>

<bundles_post_ra>
// kernel: candidate_vote_head.1
= control target key start
LH: loop header
LB: loop body
LE: loop exit
PB: predicated region body
PF: predicated region fallthrough
CT: control target
= control target key end

     0   :  { %s2678_s0 = inlined_call_operand.vmem [shape: f32[256,128], index: 0, kind: input, shape index: {}]   ;;  %s2679_s1 = inlined_call_operand.vmem [shape: bf16[128,128], index: 1, kind: input, shape index: {}]   ;;  %s2680_s2 = inlined_call_operand.vmem [shape: f32[1,128], index: 2, kind: input, shape index: {}]   ;;  %s2681_s3 = inlined_call_operand.vmem [shape: bf16[128,128], index: 3, kind: input, shape index: {}]   ;;  %s2682_s4 = inlined_call_operand.vmem [shape: f32[1,128], index: 4, kind: input, shape index: {}]   ;;  %s2683_s5 = inlined_call_operand.vmem [shape: bf16[128,256], index: 5, kind: input, shape index: {}]   ;;  %s2684_s6 = inlined_call_operand.vmem [shape: f32[1,256], index: 6, kind: input, shape index: {}]   ;;  %s2685_s7 = inlined_call_operand.vmem [shape: f32[256,8], index: 7, kind: output, shape index: {0}]   ;;  %s2686_s8 = inlined_call_operand.hbm [shape: bf16[256,128], index: 8, kind: output, shape index: {1}]  }
   0x1   :  { %v1717_v0 = vld [vmem:[%s2679_s1] sm:$0xff]   ;;  %v1718_v1 = vld [vmem:[%s2679_s1 + $0x8] sm:$0xff]   ;;  %v1719_v2 = vld [vmem:[%s2679_s1 + $0x10] sm:$0xff]  }
   0x2   :  { %1617 = vmatprep.subr.bf16.mxu1 %v1717_v0  ;;  %v1720_v3 = vld [vmem:[%s2679_s1 + $0x18] sm:$0xff]   ;;  %v1921_v4 = vld [vmem:[%s2678_s0] sm:$0xff]  ;;  %v1926_v5 = vld [vmem:[%s2678_s0 + $0x8] sm:$0xff] }
   0x3   :  { %1618 = vmatpush3.bf16.msra.mxu1 %v1717_v0  ;;  %v62_v6 = vpack.c.bf16 %v1926_v5, %v1921_v4  ;;  %v1721_v7 = vld [vmem:[%s2679_s1 + $0x20] sm:$0xff]   ;;  %v1722_v8 = vld [vmem:[%s2679_s1 + $0x28] sm:$0xff]   ;;  %v1723_v9 = vld [vmem:[%s2679_s1 + $0x30] sm:$0xff]  }
   0x4   :  { %1619 = vmatprep.subr.bf16.mxu1 %v1718_v1  ;;  %v1724_v10 = vld [vmem:[%s2679_s1 + $0x38] sm:$0xff]   ;;  %v1945_v11 = vld [vmem:[%s2678_s0 + $0x10] sm:$0xff]  ;;  %v1955_v13 = vld [vmem:[%s2678_s0 + $0x20] sm:$0xff] }
   0x5   :  { %1633 = vmatprep.mubr.bf16.mxu1 %v62_v6  ;;  %v1950_v12 = vld [vmem:[%s2678_s0 + $0x18] sm:$0xff]  ;;  %v1960_v14 = vld [vmem:[%s2678_s0 + $0x28] sm:$0xff]  ;;  %v1725_v15 = vld [vmem:[%s2681_s3] sm:$0xff]  }
   0x6   :  { %v63_v16 = vpack.c.bf16 %v1950_v12, %v1945_v11  ;;  %v64_v17 = vpack.c.bf16 %v1960_v14, %v1955_v13 }
   0x7   :  { %1620 = vmatpush3.bf16.msra.mxu1 %v1718_v1 }
   0x8   :  { %1621 = vmatprep.subr.bf16.mxu1 %v1719_v2 }
   0xb   :  { %1622 = vmatpush3.bf16.msra.mxu1 %v1719_v2 }
   0xc   :  { %1623 = vmatprep.subr.bf16.mxu1 %v1720_v3 }
   0xf   :  { %1624 = vmatpush3.bf16.msra.mxu1 %v1720_v3 }
  0x10   :  { %1625 = vmatprep.subr.bf16.mxu1 %v1721_v7 }
  0x13   :  { %1626 = vmatpush3.bf16.msra.mxu1 %v1721_v7 }
  0x14   :  { %1627 = vmatprep.subr.bf16.mxu1 %v1722_v8 }
  0x17   :  { %1628 = vmatpush3.bf16.msra.mxu1 %v1722_v8 }
  0x18   :  { %1629 = vmatprep.subr.bf16.mxu1 %v1723_v9 }
  0x1b   :  { %1630 = vmatpush3.bf16.msra.mxu1 %v1723_v9 }
  0x1c   :  { %1631 = vmatprep.subr.bf16.mxu1 %v1724_v10 }
  0x1f   :  { %1632 = vmatpush3.bf16.msra.mxu1 %v1724_v10 }
  0x20   :  { %14 = vsyncpa [#allocation3], 0  ;;  %1665 = vmatprep.subr.bf16.mxu1 %v1725_v15  ;;  %v1726_v18 = vld [vmem:[%s2681_s3 + $0x8] sm:$0xff]   ;;  %v1975_v19 = vld [vmem:[%s2678_s0 + $0x30] sm:$0xff]  ;;  %vm939_vm0 = vcmask 64512  }
  0x21   :  { %v1980_v20 = vld [vmem:[%s2678_s0 + $0x38] sm:$0xff]  ;;  %v1985_v21 = vld [vmem:[%s2678_s0 + $0x40] sm:$0xff]  ;;  %v1990_v22 = vld [vmem:[%s2678_s0 + $0x48] sm:$0xff] }
  0x22   :  { %1634 = vmatmul.mubr.bf16.vlgmr.msra.gmra.mrb[0].mxu1 %v63_v16  ;;  %v1727_v23 = vld [vmem:[%s2681_s3 + $0x10] sm:$0xff]   ;;  %v65_v24 = vpack.c.bf16 %v1980_v20, %v1975_v19  ;;  %v66_v25 = vpack.c.bf16 %v1990_v22, %v1985_v21  ;;  %v1728_v26 = vld [vmem:[%s2681_s3 + $0x18] sm:$0xff]   ;;  %v2015_v29 = vld [vmem:[%s2678_s0 + $0x60] sm:$0xff] }
  0x23   :  { %1637 = vmatprep.mubr.bf16.mxu1 %v64_v17  ;;  %1666 = vmatpush3.bf16.msra.mxu1 %v1725_v15  ;;  %v2005_v27 = vld [vmem:[%s2678_s0 + $0x50] sm:$0xff]  ;;  %v2010_v28 = vld [vmem:[%s2678_s0 + $0x58] sm:$0xff]  ;;  %v2020_v30 = vld [vmem:[%s2678_s0 + $0x68] sm:$0xff] }
  0x24   :  { %1667 = vmatprep.subr.bf16.mxu1 %v1726_v18  ;;  %v1729_v31 = vld [vmem:[%s2681_s3 + $0x20] sm:$0xff]   ;;  %v67_v32 = vpack.c.bf16 %v2010_v28, %v2005_v27  ;;  %v68_v33 = vpack.c.bf16 %v2020_v30, %v2015_v29  ;;  %v1730_v34 = vld [vmem:[%s2681_s3 + $0x28] sm:$0xff]   ;;  %v2035_v35 = vld [vmem:[%s2678_s0 + $0x70] sm:$0xff] }
  0x25   :  { %v2040_v36 = vld [vmem:[%s2678_s0 + $0x78] sm:$0xff]  ;;  %v2045_v37 = vld [vmem:[%s2678_s0 + $0x80] sm:$0xff]  ;;  %v2050_v38 = vld [vmem:[%s2678_s0 + $0x88] sm:$0xff] }
  0x26   :  { %v1731_v39 = vld [vmem:[%s2681_s3 + $0x30] sm:$0xff]   ;;  %v69_v40 = vpack.c.bf16 %v2040_v36, %v2035_v35  ;;  %v70_v41 = vpack.c.bf16 %v2050_v38, %v2045_v37  ;;  %v2067_v43 = vld [vmem:[%s2678_s0 + $0x98] sm:$0xff]  ;;  %v50_v44 = vld [vmem:[%s2678_s0 + $0xa0] sm:$0xff] }
  0x27   :  { %1668 = vmatpush3.bf16.msra.mxu1 %v1726_v18  ;;  %v2062_v42 = vld [vmem:[%s2678_s0 + $0x90] sm:$0xff]  ;;  %v51_v45 = vld [vmem:[%s2678_s0 + $0xa8] sm:$0xff]  ;;  %v53_v49 = vld [vmem:[%s2678_s0 + $0xb8] sm:$0xff] }
  0x28   :  { %1669 = vmatprep.subr.bf16.mxu1 %v1727_v23  ;;  %v71_v46 = vpack.c.bf16 %v2067_v43, %v2062_v42  ;;  %v72_v47 = vpack.c.bf16 %v51_v45, %v50_v44  ;;  %v52_v48 = vld [vmem:[%s2678_s0 + $0xb0] sm:$0xff]  ;;  %v54_v50 = vld [vmem:[%s2678_s0 + $0xc0] sm:$0xff]  ;;  %v55_v51 = vld [vmem:[%s2678_s0 + $0xc8] sm:$0xff] }
  0x29   :  { %v73_v52 = vpack.c.bf16 %v53_v49, %v52_v48  ;;  %v74_v53 = vpack.c.bf16 %v55_v51, %v54_v50  ;;  %v56_v54 = vld [vmem:[%s2678_s0 + $0xd0] sm:$0xff]  ;;  %v57_v55 = vld [vmem:[%s2678_s0 + $0xd8] sm:$0xff]  ;;  %v58_v56 = vld [vmem:[%s2678_s0 + $0xe0] sm:$0xff] }
  0x2a   :  { %1638 = vmatmul.mubr.bf16.gmra.mrb[4].mxu1 %v65_v24  ;;  %v59_v57 = vld [vmem:[%s2678_s0 + $0xe8] sm:$0xff]  ;;  %v75_v58 = vpack.c.bf16 %v57_v55, %v56_v54  ;;  %v60_v60 = vld [vmem:[%s2678_s0 + $0xf0] sm:$0xff]  ;;  %v61_v61 = vld [vmem:[%s2678_s0 + $0xf8] sm:$0xff] }
  0x2b   :  { %1641 = vmatprep.mubr.bf16.mxu1 %v66_v25  ;;  %1670 = vmatpush3.bf16.msra.mxu1 %v1727_v23  ;;  %v76_v59 = vpack.c.bf16 %v59_v57, %v58_v56  ;;  %v77_v62 = vpack.c.bf16 %v61_v61, %v60_v60  ;;  %v1732_v63 = vld [vmem:[%s2681_s3 + $0x38] sm:$0xff]   ;;  %v1733_v0 = vld [vmem:[%s2683_s5 + $0x4] ss:$8 sps:$4 sm:$0xff]   ;;  %v1735_v1 = vld [vmem:[%s2683_s5] ss:$8 sps:$4 sm:$0xff]  }
  0x2c   :  { %1671 = vmatprep.subr.bf16.mxu1 %v1728_v26  ;;  %v1736_v2 = vld [vmem:[%s2683_s5 + $0x14] ss:$8 sps:$4 sm:$0xff]   ;;  %746 = vmatprep.subr.bf16.mxu0 %v1733_v0  ;;  %v1738_v3 = vld [vmem:[%s2683_s5 + $0x10] ss:$8 sps:$4 sm:$0xff]   ;;  %v1739_v6 = vld [vmem:[%s2683_s5 + $0x24] ss:$8 sps:$4 sm:$0xff]  }
  0x2d   :  { %747 = vmatpush1.bf16.msra.mxu0 %v1735_v1  ;;  %v1741_v7 = vld [vmem:[%s2683_s5 + $0x20] ss:$8 sps:$4 sm:$0xff]   ;;  %v1742_v8 = vld [vmem:[%s2683_s5 + $0x34] ss:$8 sps:$4 sm:$0xff]   ;;  %v1744_v9 = vld [vmem:[%s2683_s5 + $0x30] ss:$8 sps:$4 sm:$0xff]  }
  0x2e   :  { %748 = vmatprep.subr.bf16.mxu0 %v1736_v2  ;;  %v1745_v10 = vld [vmem:[%s2683_s5 + $0x44] ss:$8 sps:$4 sm:$0xff]   ;;  %v1747_v15 = vld [vmem:[%s2683_s5 + $0x40] ss:$8 sps:$4 sm:$0xff]   ;;  %v1748_v16 = vld [vmem:[%s2683_s5 + $0x54] ss:$8 sps:$4 sm:$0xff]  }
  0x2f   :  { %1672 = vmatpush3.bf16.msra.mxu1 %v1728_v26  ;;  %v1750_v17 = vld [vmem:[%s2683_s5 + $0x50] ss:$8 sps:$4 sm:$0xff]   ;;  %v2149_v18 = vld [vmem:[%s2680_s2] ss:$0 sm:$0xff] }
  0x30   :  { %1673 = vmatprep.subr.bf16.mxu1 %v1729_v31 }
  0x31   :  { %749 = vmatpush1.bf16.msra.mxu0 %v1738_v3 }
  0x32   :  { %1642 = vmatmul.mubr.bf16.gmra.mrb[8].mxu1 %v67_v32  ;;  %750 = vmatprep.subr.bf16.mxu0 %v1739_v6 }
  0x33   :  { %1645 = vmatprep.mubr.bf16.mxu1 %v68_v33  ;;  %1674 = vmatpush3.bf16.msra.mxu1 %v1729_v31 }
  0x34   :  { %1675 = vmatprep.subr.bf16.mxu1 %v1730_v34 }
  0x35   :  { %751 = vmatpush1.bf16.msra.mxu0 %v1741_v7 }
  0x36   :  { %752 = vmatprep.subr.bf16.mxu0 %v1742_v8 }
  0x37   :  { %1676 = vmatpush3.bf16.msra.mxu1 %v1730_v34 }
  0x38   :  { %1677 = vmatprep.subr.bf16.mxu1 %v1731_v39 }
  0x39   :  { %753 = vmatpush1.bf16.msra.mxu0 %v1744_v9 }
  0x3a   :  { %1646 = vmatmul.mubr.bf16.gmra.mrb[12].mxu1 %v69_v40  ;;  %754 = vmatprep.subr.bf16.mxu0 %v1745_v10 }
  0x3b   :  { %1649 = vmatprep.mubr.bf16.mxu1 %v70_v41  ;;  %1678 = vmatpush3.bf16.msra.mxu1 %v1731_v39 }
  0x3c   :  { %1679 = vmatprep.subr.bf16.mxu1 %v1732_v63 }
  0x3d   :  { %755 = vmatpush1.bf16.msra.mxu0 %v1747_v15 }
  0x3e   :  { %756 = vmatprep.subr.bf16.mxu0 %v1748_v16 }
  0x3f   :  { %1680 = vmatpush3.bf16.msra.mxu1 %v1732_v63 }
  0x41   :  { %757 = vmatpush1.bf16.msra.mxu0 %v1750_v17 }
  0x42   :  { %1650 = vmatmul.mubr.bf16.gmra.mrb[16].mxu1 %v71_v46 }
  0x43   :  { %1653 = vmatprep.mubr.bf16.mxu1 %v72_v47 }
  0x4a   :  { %1654 = vmatmul.mubr.bf16.gmra.mrb[20].mxu1 %v73_v52 }
  0x4b   :  { %1657 = vmatprep.mubr.bf16.mxu1 %v74_v53 }
  0x52   :  { %1658 = vmatmul.mubr.bf16.gmra.mrb[24].mxu1 %v75_v58 }
  0x53   :  { %1661 = vmatprep.mubr.bf16.mxu1 %v76_v59 }
  0x5a   :  { %1662 = vmatmul.mubr.bf16.gmra.mrb[28].mxu1 %v77_v62 }
  0xf5   :  { %v1635_v23 = vpop.f32.mrb[0].mxu1 }
  0xf6   :  { %v192_v24 = vadd.f32 %v1635_v23, %v2149_v18  ;;  %v183_v25 = vpop.f32.mrb[1].mxu1 }
  0xf7   :  { %v184_v26 = vadd.f32 %v2149_v18, %v183_v25  ;;  %v1636_v31 = vpop.f32.mrb[2].mxu1 }
  0xf8   :  { %v195_v32 = vadd.f32 %v1636_v31, %v2149_v18  ;;  %v186_v33 = vpop.f32.mrb[3].mxu1  ;;  %v312_v39 = vmax.f32 %v192_v24, 0.0 }
  0xf9   :  { %v187_v34 = vadd.f32 %v2149_v18, %v186_v33  ;;  %v310_v41 = vmax.f32 %v184_v26, 0.0 }
  0xfa   :  { %v313_v40 = vmax.f32 %v195_v32, 0.0 }
  0xfb   :  { %v311_v44 = vmax.f32 %v187_v34, 0.0 }
  0xfc   :  { %v343_v45 = vpack.c.bf16 %v313_v40, %v312_v39 }
  0xfd   :  { %v342_v46 = vpack.c.bf16 %v311_v44, %v310_v41  ;;  %v1639_v47 = vpop.f32.mrb[4].mxu1 }
  0xfe   :  { %v208_v48 = vadd.f32 %v1639_v47, %v2149_v18  ;;  %v199_v49 = vpop.f32.mrb[5].mxu1 }
  0xff   :  { %v200_v50 = vadd.f32 %v2149_v18, %v199_v49  ;;  %1681 = vmatprep.mubr.bf16.mxu1 %v342_v46  ;;  %v1640_v51 = vpop.f32.mrb[6].mxu1 }
 0x100   :  { %v316_v52 = vmax.f32 %v208_v48, 0.0  ;;  %v211_v53 = vadd.f32 %v1640_v51, %v2149_v18  ;;  %1682 = vmatmul.mubr.bf16.vlgmr.msra.gmra.mrb[32].mxu1 %v343_v45  ;;  %v202_v54 = vpop.f32.mrb[7].mxu1 }
 0x101   :  { %v314_v55 = vmax.f32 %v200_v50, 0.0  ;;  %v203_v56 = vadd.f32 %v2149_v18, %v202_v54 }
 0x102   :  { %v317_v57 = vmax.f32 %v211_v53, 0.0 }
 0x103   :  { %v315_v58 = vmax.f32 %v203_v56, 0.0 }
 0x104   :  { %v345_v59 = vpack.c.bf16 %v317_v57, %v316_v52 }
 0x105   :  { %v344_v60 = vpack.c.bf16 %v315_v58, %v314_v55  ;;  %v1643_v61 = vpop.f32.mrb[8].mxu1 }
 0x106   :  { %v224_v62 = vadd.f32 %v1643_v61, %v2149_v18  ;;  %v215_v63 = vpop.f32.mrb[9].mxu1 }
 0x107   :  { %1685 = vmatprep.mubr.bf16.mxu1 %v344_v60  ;;  %v216_v0 = vadd.f32 %v2149_v18, %v215_v63  ;;  %v1644_v1 = vpop.f32.mrb[10].mxu1 }
 0x108   :  { %1686 = vmatmul.mubr.bf16.gmra.mrb[36].mxu1 %v345_v59  ;;  %v320_v2 = vmax.f32 %v224_v62, 0.0  ;;  %v227_v3 = vadd.f32 %v1644_v1, %v2149_v18  ;;  %v218_v6 = vpop.f32.mrb[11].mxu1 }
 0x109   :  { %v318_v7 = vmax.f32 %v216_v0, 0.0  ;;  %v219_v8 = vadd.f32 %v2149_v18, %v218_v6 }
 0x10a   :  { %v321_v9 = vmax.f32 %v227_v3, 0.0 }
 0x10b   :  { %v319_v10 = vmax.f32 %v219_v8, 0.0 }
 0x10c   :  { %v347_v15 = vpack.c.bf16 %v321_v9, %v320_v2 }
 0x10d   :  { %v346_v16 = vpack.c.bf16 %v319_v10, %v318_v7  ;;  %v1647_v17 = vpop.f32.mrb[12].mxu1 }
 0x10e   :  { %v240_v23 = vadd.f32 %v1647_v17, %v2149_v18  ;;  %v231_v24 = vpop.f32.mrb[13].mxu1 }
 0x10f   :  { %1689 = vmatprep.mubr.bf16.mxu1 %v346_v16  ;;  %v232_v25 = vadd.f32 %v2149_v18, %v231_v24  ;;  %v1648_v26 = vpop.f32.mrb[14].mxu1 }
 0x110   :  { %1690 = vmatmul.mubr.bf16.gmra.mrb[40].mxu1 %v347_v15  ;;  %v324_v31 = vmax.f32 %v240_v23, 0.0  ;;  %v243_v32 = vadd.f32 %v1648_v26, %v2149_v18  ;;  %v234_v33 = vpop.f32.mrb[15].mxu1 }
 0x111   :  { %v322_v34 = vmax.f32 %v232_v25, 0.0  ;;  %v235_v39 = vadd.f32 %v2149_v18, %v234_v33 }
 0x112   :  { %v325_v40 = vmax.f32 %v243_v32, 0.0 }
 0x113   :  { %v323_v41 = vmax.f32 %v235_v39, 0.0 }
 0x114   :  { %v349_v44 = vpack.c.bf16 %v325_v40, %v324_v31 }
 0x115   :  { %v348_v45 = vpack.c.bf16 %v323_v41, %v322_v34  ;;  %v1651_v46 = vpop.f32.mrb[16].mxu1 }
 0x116   :  { %v256_v47 = vadd.f32 %v1651_v46, %v2149_v18  ;;  %v247_v48 = vpop.f32.mrb[17].mxu1 }
 0x117   :  { %1693 = vmatprep.mubr.bf16.mxu1 %v348_v45  ;;  %v248_v49 = vadd.f32 %v2149_v18, %v247_v48  ;;  %v1652_v50 = vpop.f32.mrb[18].mxu1 }
 0x118   :  { %1694 = vmatmul.mubr.bf16.gmra.mrb[44].mxu1 %v349_v44  ;;  %v328_v51 = vmax.f32 %v256_v47, 0.0  ;;  %v259_v52 = vadd.f32 %v1652_v50, %v2149_v18  ;;  %v250_v53 = vpop.f32.mrb[19].mxu1 }
 0x119   :  { %v326_v54 = vmax.f32 %v248_v49, 0.0  ;;  %v251_v55 = vadd.f32 %v2149_v18, %v250_v53 }
 0x11a   :  { %v329_v56 = vmax.f32 %v259_v52, 0.0 }
 0x11b   :  { %v327_v57 = vmax.f32 %v251_v55, 0.0 }
 0x11c   :  { %v351_v58 = vpack.c.bf16 %v329_v56, %v328_v51 }
 0x11d   :  { %v350_v59 = vpack.c.bf16 %v327_v57, %v326_v54  ;;  %v1655_v60 = vpop.f32.mrb[20].mxu1 }
 0x11e   :  { %v272_v61 = vadd.f32 %v1655_v60, %v2149_v18  ;;  %v263_v62 = vpop.f32.mrb[21].mxu1  ;;  %v1753_v60 = vld [vmem:[%s2683_s5 + $0x60] ss:$8 sps:$4 sm:$0xff]  }
 0x11f   :  { %1697 = vmatprep.mubr.bf16.mxu1 %v350_v59  ;;  %v264_v63 = vadd.f32 %v2149_v18, %v263_v62  ;;  %v1656_v0 = vpop.f32.mrb[22].mxu1  ;;  %v1751_v59 = vld [vmem:[%s2683_s5 + $0x64] ss:$8 sps:$4 sm:$0xff]   ;;  %v1857_v62 = vmov 0  }
 0x120   :  { %1698 = vmatmul.mubr.bf16.gmra.mrb[48].mxu1 %v351_v58  ;;  %v332_v1 = vmax.f32 %v272_v61, 0.0  ;;  %v275_v2 = vadd.f32 %v1656_v0, %v2149_v18  ;;  %v266_v3 = vpop.f32.mrb[23].mxu1  ;;  %758 = vmatprep.subr.bf16.mxu0 %v1751_v59  ;;  %v1756_v61 = vld [vmem:[%s2683_s5 + $0x70] ss:$8 sps:$4 sm:$0xff]  }
 0x121   :  { %v330_v6 = vmax.f32 %v264_v63, 0.0  ;;  %v267_v7 = vadd.f32 %v2149_v18, %v266_v3  ;;  %759 = vmatpush1.bf16.msra.mxu0 %v1753_v60  ;;  %778 = vmatprep.mubr.bf16.mxu0 %v1857_v62  ;;  %v2199_v63 = vld [vmem:[%s2682_s4] ss:$0 sm:$0xff] }
 0x122   :  { %v333_v8 = vmax.f32 %v275_v2, 0.0 }
 0x123   :  { %v331_v9 = vmax.f32 %v267_v7, 0.0 }
 0x124   :  { %v353_v10 = vpack.c.bf16 %v333_v8, %v332_v1 }
 0x125   :  { %v352_v15 = vpack.c.bf16 %v331_v9, %v330_v6  ;;  %v1659_v16 = vpop.f32.mrb[24].mxu1 }
 0x126   :  { %v288_v17 = vadd.f32 %v1659_v16, %v2149_v18  ;;  %v279_v23 = vpop.f32.mrb[25].mxu1 }
 0x127   :  { %1701 = vmatprep.mubr.bf16.mxu1 %v352_v15  ;;  %v280_v24 = vadd.f32 %v2149_v18, %v279_v23  ;;  %v1660_v25 = vpop.f32.mrb[26].mxu1 }
 0x128   :  { %1702 = vmatmul.mubr.bf16.gmra.mrb[52].mxu1 %v353_v10  ;;  %v336_v26 = vmax.f32 %v288_v17, 0.0  ;;  %v291_v31 = vadd.f32 %v1660_v25, %v2149_v18  ;;  %v282_v32 = vpop.f32.mrb[27].mxu1 }
 0x129   :  { %v334_v33 = vmax.f32 %v280_v24, 0.0  ;;  %v283_v34 = vadd.f32 %v2149_v18, %v282_v32 }
 0x12a   :  { %v337_v39 = vmax.f32 %v291_v31, 0.0 }
 0x12b   :  { %v335_v40 = vmax.f32 %v283_v34, 0.0 }
 0x12c   :  { %v355_v41 = vpack.c.bf16 %v337_v39, %v336_v26 }
 0x12d   :  { %v354_v44 = vpack.c.bf16 %v335_v40, %v334_v33  ;;  %v1663_v45 = vpop.f32.mrb[28].mxu1 }
 0x12e   :  { %v304_v46 = vadd.f32 %v1663_v45, %v2149_v18  ;;  %v295_v47 = vpop.f32.mrb[29].mxu1 }
 0x12f   :  { %1705 = vmatprep.mubr.bf16.mxu1 %v354_v44  ;;  %v296_v48 = vadd.f32 %v2149_v18, %v295_v47  ;;  %v1664_v49 = vpop.f32.mrb[30].mxu1 }
 0x130   :  { %1706 = vmatmul.mubr.bf16.gmra.mrb[56].mxu1 %v355_v41  ;;  %v340_v50 = vmax.f32 %v304_v46, 0.0  ;;  %v307_v51 = vadd.f32 %v1664_v49, %v2149_v18  ;;  %v298_v52 = vpop.f32.mrb[31].mxu1 }
 0x131   :  { %v338_v53 = vmax.f32 %v296_v48, 0.0  ;;  %v299_v54 = vadd.f32 %v2149_v18, %v298_v52  ;;  %v1754_v18 = vld [vmem:[%s2683_s5 + $0x74] ss:$8 sps:$4 sm:$0xff]  }
 0x132   :  { %v341_v55 = vmax.f32 %v307_v51, 0.0  ;;  %760 = vmatprep.subr.bf16.mxu0 %v1754_v18 }
 0x133   :  { %v339_v56 = vmax.f32 %v299_v54, 0.0  ;;  %761 = vmatpush1.bf16.msra.mxu0 %v1756_v61 }
 0x134   :  { %v357_v57 = vpack.c.bf16 %v341_v55, %v340_v50 }
 0x135   :  { %v356_v58 = vpack.c.bf16 %v339_v56, %v338_v53 }
 0x137   :  { %1709 = vmatprep.mubr.bf16.mxu1 %v356_v58 }
 0x138   :  { %1710 = vmatmul.mubr.bf16.gmra.mrb[60].mxu1 %v357_v57 }
 0x1d3   :  { %v1683_v0 = vpop.f32.mrb[32].mxu1 }
 0x1d4   :  { %v472_v1 = vadd.f32 %v1683_v0, %v2199_v63  ;;  %v463_v2 = vpop.f32.mrb[33].mxu1 }
 0x1d5   :  { %v464_v3 = vadd.f32 %v2199_v63, %v463_v2  ;;  %v1684_v6 = vpop.f32.mrb[34].mxu1 }
 0x1d6   :  { %v475_v7 = vadd.f32 %v1684_v6, %v2199_v63  ;;  %v466_v8 = vpop.f32.mrb[35].mxu1  ;;  %v592_v10 = vmax.f32 %v472_v1, 0.0 }
 0x1d7   :  { %v467_v9 = vadd.f32 %v2199_v63, %v466_v8  ;;  %v590_v16 = vmax.f32 %v464_v3, 0.0 }
 0x1d8   :  { %v593_v15 = vmax.f32 %v475_v7, 0.0 }
 0x1d9   :  { %v591_v17 = vmax.f32 %v467_v9, 0.0 }
 0x1da   :  { %v623_v23 = vpack.c.bf16 %v593_v15, %v592_v10 }
 0x1db   :  { %v622_v24 = vpack.c.bf16 %v591_v17, %v590_v16  ;;  %v1687_v25 = vpop.f32.mrb[36].mxu1 }
 0x1dc   :  { %v488_v26 = vadd.f32 %v1687_v25, %v2199_v63  ;;  %v479_v31 = vpop.f32.mrb[37].mxu1 }
 0x1dd   :  { %v480_v32 = vadd.f32 %v2199_v63, %v479_v31  ;;  %779 = vmatmul.mubr.bf16.vlgmr.msra.gmra.mrb[0].mxu0 %v622_v24  ;;  %v1688_v33 = vpop.f32.mrb[38].mxu1 }
 0x1de   :  { %v596_v34 = vmax.f32 %v488_v26, 0.0  ;;  %v491_v39 = vadd.f32 %v1688_v33, %v2199_v63  ;;  %v482_v40 = vpop.f32.mrb[39].mxu1  ;;  %788 = vmatprep.mubr.bf16.mxu0 %v1857_v62 }
 0x1df   :  { %v594_v41 = vmax.f32 %v480_v32, 0.0  ;;  %v483_v44 = vadd.f32 %v2199_v63, %v482_v40 }
 0x1e0   :  { %v597_v45 = vmax.f32 %v491_v39, 0.0 }
 0x1e1   :  { %v595_v46 = vmax.f32 %v483_v44, 0.0 }
 0x1e2   :  { %v625_v47 = vpack.c.bf16 %v597_v45, %v596_v34 }
 0x1e3   :  { %v624_v48 = vpack.c.bf16 %v595_v46, %v594_v41  ;;  %v1691_v49 = vpop.f32.mrb[40].mxu1 }
 0x1e4   :  { %v504_v50 = vadd.f32 %v1691_v49, %v2199_v63  ;;  %v495_v51 = vpop.f32.mrb[41].mxu1 }
 0x1e5   :  { %789 = vmatmul.mubr.bf16.gmra.mrb[4].mxu0 %v623_v23  ;;  %v496_v52 = vadd.f32 %v2199_v63, %v495_v51  ;;  %v1692_v53 = vpop.f32.mrb[42].mxu1 }
 0x1e6   :  { %v600_v54 = vmax.f32 %v504_v50, 0.0  ;;  %798 = vmatprep.mubr.bf16.mxu0 %v1857_v62  ;;  %v507_v55 = vadd.f32 %v1692_v53, %v2199_v63  ;;  %v498_v56 = vpop.f32.mrb[43].mxu1 }
 0x1e7   :  { %v598_v57 = vmax.f32 %v496_v52, 0.0  ;;  %v499_v58 = vadd.f32 %v2199_v63, %v498_v56 }
 0x1e8   :  { %v601_v59 = vmax.f32 %v507_v55, 0.0 }
 0x1e9   :  { %v599_v60 = vmax.f32 %v499_v58, 0.0 }
 0x1ea   :  { %v627_v18 = vpack.c.bf16 %v601_v59, %v600_v54 }
 0x1eb   :  { %v626_v61 = vpack.c.bf16 %v599_v60, %v598_v57  ;;  %v1695_v0 = vpop.f32.mrb[44].mxu1 }
 0x1ec   :  { %v520_v1 = vadd.f32 %v1695_v0, %v2199_v63  ;;  %v511_v2 = vpop.f32.mrb[45].mxu1 }
 0x1ed   :  { %799 = vmatmul.mubr.bf16.gmra.mrb[8].mxu0 %v624_v48  ;;  %v512_v3 = vadd.f32 %v2199_v63, %v511_v2  ;;  %v1696_v6 = vpop.f32.mrb[46].mxu1 }
 0x1ee   :  { %808 = vmatprep.mubr.bf16.mxu0 %v1857_v62  ;;  %v604_v7 = vmax.f32 %v520_v1, 0.0  ;;  %v523_v8 = vadd.f32 %v1696_v6, %v2199_v63  ;;  %v514_v9 = vpop.f32.mrb[47].mxu1 }
 0x1ef   :  { %v602_v10 = vmax.f32 %v512_v3, 0.0  ;;  %v515_v15 = vadd.f32 %v2199_v63, %v514_v9 }
 0x1f0   :  { %v605_v16 = vmax.f32 %v523_v8, 0.0 }
 0x1f1   :  { %v603_v17 = vmax.f32 %v515_v15, 0.0 }
 0x1f2   :  { %v2220_v23 = vpack.c.bf16 %v605_v16, %v604_v7 }
 0x1f3   :  { %v628_v24 = vpack.c.bf16 %v603_v17, %v602_v10  ;;  %v1699_v25 = vpop.f32.mrb[48].mxu1 }
 0x1f4   :  { %v536_v26 = vadd.f32 %v1699_v25, %v2199_v63  ;;  %v527_v31 = vpop.f32.mrb[49].mxu1 }
 0x1f5   :  { %809 = vmatmul.mubr.bf16.gmra.mrb[12].mxu0 %v625_v47  ;;  %v528_v32 = vadd.f32 %v2199_v63, %v527_v31  ;;  %v1700_v33 = vpop.f32.mrb[50].mxu1 }
 0x1f6   :  { %818 = vmatprep.mubr.bf16.mxu0 %v1857_v62  ;;  %v608_v34 = vmax.f32 %v536_v26, 0.0  ;;  %v539_v39 = vadd.f32 %v1700_v33, %v2199_v63  ;;  %v530_v40 = vpop.f32.mrb[51].mxu1 }
 0x1f7   :  { %v606_v41 = vmax.f32 %v528_v32, 0.0  ;;  %v531_v44 = vadd.f32 %v2199_v63, %v530_v40 }
 0x1f8   :  { %v609_v45 = vmax.f32 %v539_v39, 0.0 }
 0x1f9   :  { %v607_v46 = vmax.f32 %v531_v44, 0.0 }
 0x1fa   :  { %v631_v48 = vpack.c.bf16 %v609_v45, %v608_v34 }
 0x1fb   :  { %v630_v49 = vpack.c.bf16 %v607_v46, %v606_v41  ;;  %v1703_v50 = vpop.f32.mrb[52].mxu1 }
 0x1fc   :  { %v552_v51 = vadd.f32 %v1703_v50, %v2199_v63  ;;  %v543_v47 = vpop.f32.mrb[53].mxu1 }
 0x1fd   :  { %819 = vmatmul.mubr.bf16.gmra.mrb[16].mxu0 %v626_v61  ;;  %v544_v52 = vadd.f32 %v2199_v63, %v543_v47  ;;  %v1704_v53 = vpop.f32.mrb[54].mxu1 }
 0x1fe   :  { %828 = vmatprep.mubr.bf16.mxu0 %v1857_v62  ;;  %v612_v54 = vmax.f32 %v552_v51, 0.0  ;;  %v555_v55 = vadd.f32 %v1704_v53, %v2199_v63  ;;  %v546_v56 = vpop.f32.mrb[55].mxu1 }
 0x1ff   :  { %v610_v57 = vmax.f32 %v544_v52, 0.0  ;;  %v547_v58 = vadd.f32 %v2199_v63, %v546_v56 }
 0x200   :  { %v613_v59 = vmax.f32 %v555_v55, 0.0 }
 0x201   :  { %v611_v60 = vmax.f32 %v547_v58, 0.0 }
 0x202   :  { %v633_v0 = vpack.c.bf16 %v613_v59, %v612_v54 }
 0x203   :  { %v632_v1 = vpack.c.bf16 %v611_v60, %v610_v57  ;;  %v1707_v2 = vpop.f32.mrb[56].mxu1 }
 0x204   :  { %v568_v3 = vadd.f32 %v1707_v2, %v2199_v63  ;;  %v559_v61 = vpop.f32.mrb[57].mxu1 }
 0x205   :  { %829 = vmatmul.mubr.bf16.gmra.mrb[20].mxu0 %v627_v18  ;;  %v560_v6 = vadd.f32 %v2199_v63, %v559_v61  ;;  %v1708_v7 = vpop.f32.mrb[58].mxu1 }
 0x206   :  { %838 = vmatprep.mubr.bf16.mxu0 %v1857_v62  ;;  %v616_v8 = vmax.f32 %v568_v3, 0.0  ;;  %v571_v9 = vadd.f32 %v1708_v7, %v2199_v63  ;;  %v562_v10 = vpop.f32.mrb[59].mxu1 }
 0x207   :  { %v614_v15 = vmax.f32 %v560_v6, 0.0  ;;  %v563_v16 = vadd.f32 %v2199_v63, %v562_v10 }
 0x208   :  { %v617_v17 = vmax.f32 %v571_v9, 0.0 }
 0x209   :  { %v615_v25 = vmax.f32 %v563_v16, 0.0 }
 0x20a   :  { %v635_v26 = vpack.c.bf16 %v617_v17, %v616_v8 }
 0x20b   :  { %v634_v31 = vpack.c.bf16 %v615_v25, %v614_v15  ;;  %v1711_v32 = vpop.f32.mrb[60].mxu1 }
 0x20c   :  { %v584_v33 = vadd.f32 %v1711_v32, %v2199_v63  ;;  %v575_v18 = vpop.f32.mrb[61].mxu1 }
 0x20d   :  { %839 = vmatmul.mubr.bf16.gmra.mrb[24].mxu0 %v628_v24  ;;  %v576_v34 = vadd.f32 %v2199_v63, %v575_v18  ;;  %v1712_v39 = vpop.f32.mrb[62].mxu1 }
 0x20e   :  { %848 = vmatprep.mubr.bf16.mxu0 %v1857_v62  ;;  %v620_v40 = vmax.f32 %v584_v33, 0.0  ;;  %v587_v41 = vadd.f32 %v1712_v39, %v2199_v63  ;;  %v578_v44 = vpop.f32.mrb[63].mxu1 }
 0x20f   :  { %v618_v45 = vmax.f32 %v576_v34, 0.0  ;;  %v579_v46 = vadd.f32 %v2199_v63, %v578_v44  ;;  %v656_v63 = vlaneseq }
 0x210   :  { %v621_v50 = vmax.f32 %v587_v41, 0.0 }
 0x211   :  { %v619_v51 = vmax.f32 %v579_v46, 0.0 }
 0x212   :  { %v637_v47 = vpack.c.bf16 %v621_v50, %v620_v40 }
 0x213   :  { %v636_v52 = vpack.c.bf16 %v619_v51, %v618_v45 }
 0x215   :  { %849 = vmatmul.mubr.bf16.gmra.mrb[28].mxu0 %v2220_v23  ;;  %v657_v23 = vshrl.u32 %v656_v63, 7 }
 0x216   :  { %858 = vmatprep.mubr.bf16.mxu0 %v1857_v62 }
 0x217   :  { %v658_v24 = vsub.s32 0, %v657_v23 }
 0x21d   :  { %859 = vmatmul.mubr.bf16.gmra.mrb[32].mxu0 %v630_v49  ;;  %v662_v49 = vsub.s32 1, %v657_v23 }
 0x21e   :  { %868 = vmatprep.mubr.bf16.mxu0 %v1857_v62 }
 0x225   :  { %869 = vmatmul.mubr.bf16.gmra.mrb[36].mxu0 %v631_v48  ;;  %v654_v48 = vld [vmem:[%s2684_s6] sm:$0x3] }
 0x226   :  { %878 = vmatprep.mubr.bf16.mxu0 %v1857_v62  ;;  %v2254_v53 = vrot.slane %v654_v48, %v658_v24  ;;  %v2256_v54 = vrot.slane %v654_v48, %v662_v49 }
 0x22d   :  { %879 = vmatmul.mubr.bf16.gmra.mrb[40].mxu0 %v632_v1 }
 0x22e   :  { %888 = vmatprep.mubr.bf16.mxu0 %v1857_v62 }
 0x235   :  { %889 = vmatmul.mubr.bf16.gmra.mrb[44].mxu0 %v633_v0 }
 0x236   :  { %898 = vmatprep.mubr.bf16.mxu0 %v1857_v62 }
 0x23d   :  { %899 = vmatmul.mubr.bf16.gmra.mrb[48].mxu0 %v634_v31 }
 0x23e   :  { %908 = vmatprep.mubr.bf16.mxu0 %v1857_v62 }
 0x245   :  { %909 = vmatmul.mubr.bf16.gmra.mrb[52].mxu0 %v635_v26 }
 0x246   :  { %918 = vmatprep.mubr.bf16.mxu0 %v1857_v62 }
 0x24d   :  { %919 = vmatmul.mubr.bf16.gmra.mrb[56].mxu0 %v636_v52 }
 0x24e   :  { %928 = vmatprep.mubr.bf16.mxu0 %v1857_v62 }
 0x255   :  { %929 = vmatmul.mubr.bf16.gmra.mrb[60].mxu0 %v637_v47 }
 0x2b0   :  { %v780_v55 = vpop.f32.mrb[0].mxu0 }
 0x2b1   :  { %v781_v56 = vadd.f32 %v780_v55, %v2254_v53  ;;  %v782_v57 = vpop.f32.mrb[1].mxu0 }
 0x2b2   :  { %v783_v62 = vadd.f32 %v782_v57, %v2256_v54  ;;  %v784_v58 = vpop.f32.mrb[2].mxu0 }
 0x2b3   :  { %940 = vst.msk [vmem:[%s2685_s7] sm:$0xff] %vm939_vm0, %v781_v56  ;;  %v785_v59 = vadd.f32 %v784_v58, %v2254_v53  ;;  %v786_v60 = vpop.f32.mrb[3].mxu0 }
 0x2b4   :  { %v787_v0 = vadd.f32 %v786_v60, %v2256_v54  ;;  %v2267_v1 = vadd.f32 %v783_v62, %v1921_v4 }
 0x2b5   :  { %941 = vst.msk [vmem:[%s2685_s7 + $0x8] sm:$0xff] %vm939_vm0, %v785_v59 }
 0x2b6   :  { %v2274_v2 = vadd.f32 %v787_v0, %v1926_v5  ;;  %v1004_v3 = vmul.f32 %v2267_v1, %v2267_v1 }
 0x2b8   :  { %v790_v61 = vpop.f32.mrb[4].mxu0  ;;  %1036 = vadd.xlane.f32.xlu0 %v1004_v3  ;;  %v1005_v9 = vmul.f32 %v2274_v2, %v2274_v2 }
 0x2b9   :  { %v791_v6 = vadd.f32 %v790_v61, %v2254_v53  ;;  %v792_v7 = vpop.f32.mrb[5].mxu0 }
 0x2ba   :  { %v793_v8 = vadd.f32 %v792_v7, %v2256_v54  ;;  %v794_v4 = vpop.f32.mrb[6].mxu0 }
 0x2bb   :  { %942 = vst.msk [vmem:[%s2685_s7 + $0x10] sm:$0xff] %vm939_vm0, %v791_v6  ;;  %v795_v5 = vadd.f32 %v794_v4, %v2254_v53  ;;  %v796_v10 = vpop.f32.mrb[7].mxu0 }
 0x2bc   :  { %v797_v15 = vadd.f32 %v796_v10, %v2256_v54  ;;  %1038 = vadd.xlane.f32.xlu0 %v1005_v9  ;;  %v2289_v16 = vadd.f32 %v793_v8, %v1945_v11 }
 0x2bd   :  { %943 = vst.msk [vmem:[%s2685_s7 + $0x18] sm:$0xff] %vm939_vm0, %v795_v5 }
 0x2be   :  { %v2296_v17 = vadd.f32 %v797_v15, %v1950_v12  ;;  %v1006_v25 = vmul.f32 %v2289_v16, %v2289_v16 }
 0x2c0   :  { %v800_v26 = vpop.f32.mrb[8].mxu0  ;;  %1040 = vadd.xlane.f32.xlu1 %v1006_v25  ;;  %v1007_v18 = vmul.f32 %v2296_v17, %v2296_v17 }
 0x2c1   :  { %v801_v31 = vadd.f32 %v800_v26, %v2254_v53  ;;  %v802_v32 = vpop.f32.mrb[9].mxu0 }
 0x2c2   :  { %v803_v33 = vadd.f32 %v802_v32, %v2256_v54  ;;  %v804_v11 = vpop.f32.mrb[10].mxu0 }
 0x2c3   :  { %944 = vst.msk [vmem:[%s2685_s7 + $0x20] sm:$0xff] %vm939_vm0, %v801_v31  ;;  %v805_v12 = vadd.f32 %v804_v11, %v2254_v53  ;;  %v806_v34 = vpop.f32.mrb[11].mxu0 }
 0x2c4   :  { %v2310_v39 = vadd.f32 %v803_v33, %v1955_v13  ;;  %v807_v40 = vadd.f32 %v806_v34, %v2256_v54  ;;  %1042 = vadd.xlane.f32.xlu1 %v1007_v18 }
 0x2c5   :  { %945 = vst.msk [vmem:[%s2685_s7 + $0x28] sm:$0xff] %vm939_vm0, %v805_v12 }
 0x2c6   :  { %v2318_v41 = vadd.f32 %v807_v40, %v1960_v14  ;;  %v1008_v44 = vmul.f32 %v2310_v39, %v2310_v39 }
 0x2c8   :  { %v810_v45 = vpop.f32.mrb[12].mxu0  ;;  %1044 = vadd.xlane.f32.xlu0 %v1008_v44  ;;  %v1009_v13 = vmul.f32 %v2318_v41, %v2318_v41 }
 0x2c9   :  { %v811_v46 = vadd.f32 %v810_v45, %v2254_v53  ;;  %v812_v50 = vpop.f32.mrb[13].mxu0 }
 0x2ca   :  { %v813_v51 = vadd.f32 %v812_v50, %v2256_v54  ;;  %v814_v47 = vpop.f32.mrb[14].mxu0  ;;  %1046 = vadd.xlane.f32.xlu1 %v1009_v13 }
 0x2cb   :  { %946 = vst.msk [vmem:[%s2685_s7 + $0x30] sm:$0xff] %vm939_vm0, %v811_v46  ;;  %v815_v14 = vadd.f32 %v814_v47, %v2254_v53  ;;  %v816_v52 = vpop.f32.mrb[15].mxu0 }
 0x2cc   :  { %v2332_v63 = vadd.f32 %v813_v51, %v1975_v19  ;;  %v817_v23 = vadd.f32 %v816_v52, %v2256_v54 }
 0x2cd   :  { %947 = vst.msk [vmem:[%s2685_s7 + $0x38] sm:$0xff] %vm939_vm0, %v815_v14 }
 0x2ce   :  { %v2340_v24 = vadd.f32 %v817_v23, %v1980_v20  ;;  %v1010_v48 = vmul.f32 %v2332_v63, %v2332_v63 }
 0x2d0   :  { %v820_v49 = vpop.f32.mrb[16].mxu0  ;;  %1048 = vadd.xlane.f32.xlu0 %v1010_v48  ;;  %v1011_v55 = vmul.f32 %v2340_v24, %v2340_v24 }
 0x2d1   :  { %v821_v19 = vadd.f32 %v820_v49, %v2254_v53  ;;  %v822_v56 = vpop.f32.mrb[17].mxu0 }
 0x2d2   :  { %v823_v57 = vadd.f32 %v822_v56, %v2256_v54  ;;  %v824_v62 = vpop.f32.mrb[18].mxu0  ;;  %1050 = vadd.xlane.f32.xlu1 %v1011_v55 }
 0x2d3   :  { %948 = vst.msk [vmem:[%s2685_s7 + $0x40] sm:$0xff] %vm939_vm0, %v821_v19  ;;  %v825_v20 = vadd.f32 %v824_v62, %v2254_v53  ;;  %v826_v58 = vpop.f32.mrb[19].mxu0 }
 0x2d4   :  { %v2354_v59 = vadd.f32 %v823_v57, %v1985_v21  ;;  %v827_v60 = vadd.f32 %v826_v58, %v2256_v54 }
 0x2d5   :  { %949 = vst.msk [vmem:[%s2685_s7 + $0x48] sm:$0xff] %vm939_vm0, %v825_v20 }
 0x2d6   :  { %v2362_v0 = vadd.f32 %v827_v60, %v1990_v22  ;;  %v1012_v3 = vmul.f32 %v2354_v59, %v2354_v59 }
 0x2d8   :  { %v830_v61 = vpop.f32.mrb[20].mxu0  ;;  %1052 = vadd.xlane.f32.xlu0 %v1012_v3  ;;  %v1013_v6 = vmul.f32 %v2362_v0, %v2362_v0 }
 0x2d9   :  { %v831_v21 = vadd.f32 %v830_v61, %v2254_v53  ;;  %v832_v7 = vpop.f32.mrb[21].mxu0 }
 0x2da   :  { %v833_v8 = vadd.f32 %v832_v7, %v2256_v54  ;;  %v834_v4 = vpop.f32.mrb[22].mxu0  ;;  %1054 = vadd.xlane.f32.xlu1 %v1013_v6 }
 0x2db   :  { %950 = vst.msk [vmem:[%s2685_s7 + $0x50] sm:$0xff] %vm939_vm0, %v831_v21  ;;  %v835_v22 = vadd.f32 %v834_v4, %v2254_v53  ;;  %v836_v9 = vpop.f32.mrb[23].mxu0 }
 0x2dc   :  { %v2376_v5 = vadd.f32 %v833_v8, %v2005_v27  ;;  %v837_v10 = vadd.f32 %v836_v9, %v2256_v54 }
 0x2dd   :  { %951 = vst.msk [vmem:[%s2685_s7 + $0x58] sm:$0xff] %vm939_vm0, %v835_v22 }
 0x2de   :  { %v2384_v15 = vadd.f32 %v837_v10, %v2010_v28  ;;  %v1014_v25 = vmul.f32 %v2376_v5, %v2376_v5 }
 0x2e0   :  { %v840_v26 = vpop.f32.mrb[24].mxu0  ;;  %1056 = vadd.xlane.f32.xlu0 %v1014_v25  ;;  %v1015_v31 = vmul.f32 %v2384_v15, %v2384_v15 }
 0x2e1   :  { %v841_v27 = vadd.f32 %v840_v26, %v2254_v53  ;;  %v842_v32 = vpop.f32.mrb[25].mxu0 }
 0x2e2   :  { %v843_v33 = vadd.f32 %v842_v32, %v2256_v54  ;;  %v844_v11 = vpop.f32.mrb[26].mxu0  ;;  %1058 = vadd.xlane.f32.xlu1 %v1015_v31 }
 0x2e3   :  { %952 = vst.msk [vmem:[%s2685_s7 + $0x60] sm:$0xff] %vm939_vm0, %v841_v27  ;;  %v845_v28 = vadd.f32 %v844_v11, %v2254_v53  ;;  %v846_v18 = vpop.f32.mrb[27].mxu0 }
 0x2e4   :  { %v2398_v12 = vadd.f32 %v843_v33, %v2015_v29  ;;  %v847_v34 = vadd.f32 %v846_v18, %v2256_v54 }
 0x2e5   :  { %953 = vst.msk [vmem:[%s2685_s7 + $0x68] sm:$0xff] %vm939_vm0, %v845_v28  ;;  %v1821_v28 = vld [vmem:[%s2678_s0 + $0xa0] sm:$0xff] }
 0x2e6   :  { %v2406_v40 = vadd.f32 %v847_v34, %v2020_v30  ;;  %v1016_v44 = vmul.f32 %v2398_v12, %v2398_v12 }
 0x2e8   :  { %v850_v45 = vpop.f32.mrb[28].mxu0  ;;  %1060 = vadd.xlane.f32.xlu0 %v1016_v44  ;;  %v1017_v13 = vmul.f32 %v2406_v40, %v2406_v40  ;;  %v1822_v44 = vld [vmem:[%s2678_s0 + $0xa8] sm:$0xff] }
 0x2e9   :  { %v851_v29 = vadd.f32 %v850_v45, %v2254_v53  ;;  %v852_v46 = vpop.f32.mrb[29].mxu0 }
 0x2ea   :  { %v853_v50 = vadd.f32 %v852_v46, %v2256_v54  ;;  %v854_v51 = vpop.f32.mrb[30].mxu0  ;;  %1062 = vadd.xlane.f32.xlu1 %v1017_v13 }
 0x2eb   :  { %954 = vst.msk [vmem:[%s2685_s7 + $0x70] sm:$0xff] %vm939_vm0, %v851_v29  ;;  %v855_v30 = vadd.f32 %v854_v51, %v2254_v53  ;;  %v856_v47 = vpop.f32.mrb[31].mxu0 }
 0x2ec   :  { %v2420_v14 = vadd.f32 %v853_v50, %v2035_v35  ;;  %v857_v52 = vadd.f32 %v856_v47, %v2256_v54 }
 0x2ed   :  { %955 = vst.msk [vmem:[%s2685_s7 + $0x78] sm:$0xff] %vm939_vm0, %v855_v30 }
 0x2ee   :  { %v2428_v23 = vadd.f32 %v857_v52, %v2040_v36  ;;  %v1018_v48 = vmul.f32 %v2420_v14, %v2420_v14 }
 0x2f0   :  { %v860_v49 = vpop.f32.mrb[32].mxu0  ;;  %1064 = vadd.xlane.f32.xlu0 %v1018_v48  ;;  %v1019_v55 = vmul.f32 %v2428_v23, %v2428_v23 }
 0x2f1   :  { %v861_v35 = vadd.f32 %v860_v49, %v2254_v53  ;;  %v862_v19 = vpop.f32.mrb[33].mxu0  ;;  %v1823_v49 = vld [vmem:[%s2678_s0 + $0xb0] sm:$0xff] }
 0x2f2   :  { %v863_v56 = vadd.f32 %v862_v19, %v2256_v54  ;;  %v864_v57 = vpop.f32.mrb[34].mxu0  ;;  %1066 = vadd.xlane.f32.xlu1 %v1019_v55  ;;  %v1824_v19 = vld [vmem:[%s2678_s0 + $0xb8] sm:$0xff] }
 0x2f3   :  { %956 = vst.msk [vmem:[%s2685_s7 + $0x80] sm:$0xff] %vm939_vm0, %v861_v35  ;;  %v865_v36 = vadd.f32 %v864_v57, %v2254_v53  ;;  %v866_v62 = vpop.f32.mrb[35].mxu0 }
 0x2f4   :  { %v2442_v20 = vadd.f32 %v863_v56, %v2045_v37  ;;  %v867_v58 = vadd.f32 %v866_v62, %v2256_v54 }
 0x2f5   :  { %957 = vst.msk [vmem:[%s2685_s7 + $0x88] sm:$0xff] %vm939_vm0, %v865_v36 }
 0x2f6   :  { %v2450_v60 = vadd.f32 %v867_v58, %v2050_v38  ;;  %v1020_v3 = vmul.f32 %v2442_v20, %v2442_v20 }
 0x2f8   :  { %v870_v61 = vpop.f32.mrb[36].mxu0  ;;  %1068 = vadd.xlane.f32.xlu0 %v1020_v3  ;;  %v1021_v6 = vmul.f32 %v2450_v60, %v2450_v60 }
 0x2f9   :  { %v871_v37 = vadd.f32 %v870_v61, %v2254_v53  ;;  %v872_v21 = vpop.f32.mrb[37].mxu0 }
 0x2fa   :  { %v873_v7 = vadd.f32 %v872_v21, %v2256_v54  ;;  %v874_v8 = vpop.f32.mrb[38].mxu0  ;;  %1070 = vadd.xlane.f32.xlu1 %v1021_v6 }
 0x2fb   :  { %958 = vst.msk [vmem:[%s2685_s7 + $0x90] sm:$0xff] %vm939_vm0, %v871_v37  ;;  %v875_v38 = vadd.f32 %v874_v8, %v2254_v53  ;;  %v876_v4 = vpop.f32.mrb[39].mxu0 }
 0x2fc   :  { %v2464_v22 = vadd.f32 %v873_v7, %v2062_v42  ;;  %v877_v9 = vadd.f32 %v876_v4, %v2256_v54  ;;  %v1825_v7 = vld [vmem:[%s2678_s0 + $0xc0] sm:$0xff]  ;;  %v1826_v4 = vld [vmem:[%s2678_s0 + $0xc8] sm:$0xff] }
 0x2fd   :  { %959 = vst.msk [vmem:[%s2685_s7 + $0x98] sm:$0xff] %vm939_vm0, %v875_v38 }
 0x2fe   :  { %v2472_v10 = vadd.f32 %v877_v9, %v2067_v43  ;;  %v1022_v25 = vmul.f32 %v2464_v22, %v2464_v22 }
 0x300   :  { %v880_v26 = vpop.f32.mrb[40].mxu0  ;;  %1072 = vadd.xlane.f32.xlu0 %v1022_v25  ;;  %v1023_v31 = vmul.f32 %v2472_v10, %v2472_v10 }
 0x301   :  { %v881_v42 = vadd.f32 %v880_v26, %v2254_v53  ;;  %v882_v27 = vpop.f32.mrb[41].mxu0 }
 0x302   :  { %v883_v32 = vadd.f32 %v882_v27, %v2256_v54  ;;  %v884_v33 = vpop.f32.mrb[42].mxu0  ;;  %1074 = vadd.xlane.f32.xlu1 %v1023_v31 }
 0x303   :  { %960 = vst.msk [vmem:[%s2685_s7 + $0xa0] sm:$0xff] %vm939_vm0, %v881_v42  ;;  %v885_v43 = vadd.f32 %v884_v33, %v2254_v53  ;;  %v886_v11 = vpop.f32.mrb[43].mxu0 }
 0x304   :  { %v2488_v18 = vadd.f32 %v1821_v28, %v883_v32  ;;  %v887_v34 = vadd.f32 %v886_v11, %v2256_v54  ;;  %v1827_v28 = vld [vmem:[%s2678_s0 + $0xd0] sm:$0xff] }
 0x305   :  { %961 = vst.msk [vmem:[%s2685_s7 + $0xa8] sm:$0xff] %vm939_vm0, %v885_v43 }
 0x306   :  { %v2498_v45 = vadd.f32 %v1822_v44, %v887_v34  ;;  %v1024_v13 = vmul.f32 %v2488_v18, %v2488_v18 }
 0x308   :  { %v890_v29 = vpop.f32.mrb[44].mxu0  ;;  %1076 = vadd.xlane.f32.xlu0 %v1024_v13  ;;  %v1025_v46 = vmul.f32 %v2498_v45, %v2498_v45  ;;  %v1828_v13 = vld [vmem:[%s2678_s0 + $0xd8] sm:$0xff] }
 0x309   :  { %v891_v50 = vadd.f32 %v890_v29, %v2254_v53  ;;  %v892_v51 = vpop.f32.mrb[45].mxu0 }
 0x30a   :  { %v893_v30 = vadd.f32 %v892_v51, %v2256_v54  ;;  %v894_v47 = vpop.f32.mrb[46].mxu0  ;;  %1078 = vadd.xlane.f32.xlu1 %v1025_v46 }
 0x30b   :  { %962 = vst.msk [vmem:[%s2685_s7 + $0xb0] sm:$0xff] %vm939_vm0, %v891_v50  ;;  %v895_v52 = vadd.f32 %v894_v47, %v2254_v53  ;;  %v896_v48 = vpop.f32.mrb[47].mxu0 }
 0x30c   :  { %v2514_v55 = vadd.f32 %v1823_v49, %v893_v30  ;;  %v897_v35 = vadd.f32 %v896_v48, %v2256_v54 }
 0x30d   :  { %963 = vst.msk [vmem:[%s2685_s7 + $0xb8] sm:$0xff] %vm939_vm0, %v895_v52 }
 0x30e   :  { %v2524_v56 = vadd.f32 %v1824_v19, %v897_v35  ;;  %v1026_v57 = vmul.f32 %v2514_v55, %v2514_v55  ;;  %v1829_v19 = vld [vmem:[%s2678_s0 + $0xe0] sm:$0xff] }
 0x310   :  { %v900_v36 = vpop.f32.mrb[48].mxu0  ;;  %1080 = vadd.xlane.f32.xlu0 %v1026_v57  ;;  %v1027_v62 = vmul.f32 %v2524_v56, %v2524_v56 }
 0x311   :  { %v901_v58 = vadd.f32 %v900_v36, %v2254_v53  ;;  %v902_v3 = vpop.f32.mrb[49].mxu0 }
 0x312   :  { %v903_v61 = vadd.f32 %v902_v3, %v2256_v54  ;;  %v904_v6 = vpop.f32.mrb[50].mxu0  ;;  %1082 = vadd.xlane.f32.xlu1 %v1027_v62  ;;  %v1830_v62 = vld [vmem:[%s2678_s0 + $0xe8] sm:$0xff] }
 0x313   :  { %964 = vst.msk [vmem:[%s2685_s7 + $0xc0] sm:$0xff] %vm939_vm0, %v901_v58  ;;  %v905_v37 = vadd.f32 %v904_v6, %v2254_v53  ;;  %v906_v21 = vpop.f32.mrb[51].mxu0 }
 0x314   :  { %v2540_v8 = vadd.f32 %v1825_v7, %v903_v61  ;;  %v907_v38 = vadd.f32 %v906_v21, %v2256_v54 }
 0x315   :  { %965 = vst.msk [vmem:[%s2685_s7 + $0xc8] sm:$0xff] %vm939_vm0, %v905_v37 }
 0x316   :  { %v2550_v9 = vadd.f32 %v1826_v4, %v907_v38  ;;  %v1028_v25 = vmul.f32 %v2540_v8, %v2540_v8 }
 0x318   :  { %v910_v26 = vpop.f32.mrb[52].mxu0  ;;  %1084 = vadd.xlane.f32.xlu0 %v1028_v25  ;;  %v1029_v31 = vmul.f32 %v2550_v9, %v2550_v9 }
 0x319   :  { %v911_v42 = vadd.f32 %v910_v26, %v2254_v53  ;;  %v912_v27 = vpop.f32.mrb[53].mxu0  ;;  %v1831_v26 = vld [vmem:[%s2678_s0 + $0xf0] sm:$0xff] }
 0x31a   :  { %v913_v32 = vadd.f32 %v912_v27, %v2256_v54  ;;  %v914_v33 = vpop.f32.mrb[54].mxu0  ;;  %1086 = vadd.xlane.f32.xlu1 %v1029_v31  ;;  %v1832_v27 = vld [vmem:[%s2678_s0 + $0xf8] sm:$0xff]  ;;  %s1858_s0 = smov [#allocation2]  }
 0x31b   :  { %966 = vst.msk [vmem:[%s2685_s7 + $0xd0] sm:$0xff] %vm939_vm0, %v911_v42  ;;  %v915_v43 = vadd.f32 %v914_v33, %v2254_v53  ;;  %v916_v11 = vpop.f32.mrb[55].mxu0 }
 0x31c   :  { %v2566_v34 = vadd.f32 %v1827_v28, %v913_v32  ;;  %v917_v44 = vadd.f32 %v916_v11, %v2256_v54 }
 0x31d   :  { %967 = vst.msk [vmem:[%s2685_s7 + $0xd8] sm:$0xff] %vm939_vm0, %v915_v43 }
 0x31e   :  { %v2576_v29 = vadd.f32 %v1828_v13, %v917_v44  ;;  %v1030_v46 = vmul.f32 %v2566_v34, %v2566_v34 }
 0x320   :  { %v920_v50 = vpop.f32.mrb[56].mxu0  ;;  %1088 = vadd.xlane.f32.xlu0 %v1030_v46  ;;  %v1031_v51 = vmul.f32 %v2576_v29, %v2576_v29 }
 0x321   :  { %v921_v30 = vadd.f32 %v920_v50, %v2254_v53  ;;  %v922_v47 = vpop.f32.mrb[57].mxu0 }
 0x322   :  { %v923_v52 = vadd.f32 %v922_v47, %v2256_v54  ;;  %v924_v48 = vpop.f32.mrb[58].mxu0  ;;  %1090 = vadd.xlane.f32.xlu1 %v1031_v51 }
 0x323   :  { %968 = vst.msk [vmem:[%s2685_s7 + $0xe0] sm:$0xff] %vm939_vm0, %v921_v30  ;;  %v925_v49 = vadd.f32 %v924_v48, %v2254_v53  ;;  %v926_v35 = vpop.f32.mrb[59].mxu0 }
 0x324   :  { %v2592_v57 = vadd.f32 %v1829_v19, %v923_v52  ;;  %v927_v36 = vadd.f32 %v926_v35, %v2256_v54 }
 0x325   :  { %969 = vst.msk [vmem:[%s2685_s7 + $0xe8] sm:$0xff] %vm939_vm0, %v925_v49 }
 0x326   :  { %v2602_v58 = vadd.f32 %v1830_v62, %v927_v36  ;;  %v1032_v3 = vmul.f32 %v2592_v57, %v2592_v57 }
 0x328   :  { %v930_v61 = vpop.f32.mrb[60].mxu0  ;;  %1092 = vadd.xlane.f32.xlu0 %v1032_v3  ;;  %v1033_v6 = vmul.f32 %v2602_v58, %v2602_v58 }
 0x329   :  { %v931_v37 = vadd.f32 %v930_v61, %v2254_v53  ;;  %v932_v21 = vpop.f32.mrb[61].mxu0 }
 0x32a   :  { %v933_v7 = vadd.f32 %v932_v21, %v2256_v54  ;;  %v934_v38 = vpop.f32.mrb[62].mxu0  ;;  %1094 = vadd.xlane.f32.xlu1 %v1033_v6 }
 0x32b   :  { %970 = vst.msk [vmem:[%s2685_s7 + $0xf0] sm:$0xff] %vm939_vm0, %v931_v37  ;;  %v935_v4 = vadd.f32 %v934_v38, %v2254_v53  ;;  %v936_v25 = vpop.f32.mrb[63].mxu0 }
 0x32c   :  { %v2618_v31 = vadd.f32 %v1831_v26, %v933_v7  ;;  %v937_v42 = vadd.f32 %v936_v25, %v2256_v54 }
 0x32d   :  { %971 = vst.msk [vmem:[%s2685_s7 + $0xf8] sm:$0xff] %vm939_vm0, %v935_v4  ;;  %s1363_s7 = sshll.u32 %s1858_s0, 4  ;;  %s1364_s7 = int_to_ptr.vmem [resolvable:$true] %s1363_s7 }
 0x32e   :  { %v2628_v32 = vadd.f32 %v1832_v27, %v937_v42  ;;  %v1034_v53 = vmul.f32 %v2618_v31, %v2618_v31  ;;  %s1833_s22 = scalar_lea.vmem %s1364_s7, 2048  ;;  %p1838_p1 = scmp.lt.s32.totalorder %s1364_s7, %s1364_s7 }
 0x32f   :  { %p1834_p0 = scmp.ne.s32.totalorder %s1364_s7, %s1833_s22  ;;  %p1839_p2 = scmp.lt.s32.totalorder %s1833_s22, %s1833_s22 }
 0x330   :  { %1096 = vadd.xlane.f32.xlu0 %v1034_v53  ;;  %v1035_v33 = vmul.f32 %v2628_v32, %v2628_v32 }
 0x331   :  { %p1840_p3 = por %p1839_p2, %p1838_p1 }
 0x332   :  { %1098 = vadd.xlane.f32.xlu1 %v1035_v33 }
 0x333   :  { %p1841_p4 = pnand %p1840_p3, %p1834_p0 }
 0x345   :  { %v1037_v54 = vpop.xlane.xlu0 %1036 }
 0x346   :  { %v1100_v43 = vmax.f32 %v1037_v54, 1e-24 }
 0x348   :  { %1757 = vrsqrt.f32 %v1100_v43 }
 0x349   :  { %v1039_v11 = vpop.xlane.xlu0 %1038 }
 0x34a   :  { %v1101_v28 = vmax.f32 %v1039_v11, 1e-24 }
 0x34c   :  { %1759 = vrsqrt.f32 %v1101_v28 }
 0x34d   :  { %v1041_v44 = vpop.xlane.xlu1 %1040 }
 0x34e   :  { %v1102_v13 = vmax.f32 %v1041_v44, 1e-24 }
 0x350   :  { %1761 = vrsqrt.f32 %v1102_v13 }
 0x351   :  { %v1043_v46 = vpop.xlane.xlu1 %1042 }
 0x352   :  { %v1103_v50 = vmax.f32 %v1043_v46, 1e-24  ;;  %v1758_v51 = vpop.eup %1757 }
 0x353   :  { %v1164_v48 = vmul.f32 %v1758_v51, %v2267_v1 }
 0x354   :  { %1763 = vrsqrt.f32 %v1103_v50 }
 0x355   :  { %v1045_v30 = vpop.xlane.xlu0 %1044 }
 0x356   :  { %v1760_v47 = vpop.eup %1759  ;;  %v1104_v52 = vmax.f32 %v1045_v30, 1e-24 }
 0x357   :  { %v1165_v49 = vmul.f32 %v1760_v47, %v2274_v2  ;;  %v1047_v35 = vpop.xlane.xlu1 %1046 }
 0x358   :  { %1765 = vrsqrt.f32 %v1104_v52  ;;  %v1105_v19 = vmax.f32 %v1047_v35, 1e-24 }
 0x359   :  { %v1477_v36 = vpack.c.bf16 %v1165_v49, %v1164_v48 }
 0x35a   :  { %1767 = vrsqrt.f32 %v1105_v19  ;;  %v1762_v62 = vpop.eup %1761 }
 0x35b   :  { %1478 = vst [vmem:[#allocation2] sm:$0xff] %v1477_v36   ;;  %v1166_v37 = vmul.f32 %v1762_v62, %v2289_v16 }
 0x35d   :  { %v1049_v3 = vpop.xlane.xlu0 %1048 }
 0x35e   :  { %v1764_v61 = vpop.eup %1763  ;;  %v1106_v6 = vmax.f32 %v1049_v3, 1e-24 }
 0x35f   :  { %v1167_v21 = vmul.f32 %v1764_v61, %v2296_v17  ;;  %v1051_v7 = vpop.xlane.xlu1 %1050 }
 0x360   :  { %1769 = vrsqrt.f32 %v1106_v6  ;;  %v1107_v38 = vmax.f32 %v1051_v7, 1e-24 }
 0x361   :  { %v1482_v1 = vpack.c.bf16 %v1167_v21, %v1166_v37 }
 0x362   :  { %v1766_v4 = vpop.eup %1765  ;;  %1771 = vrsqrt.f32 %v1107_v38 }
 0x363   :  { %1554 = vst [vmem:[#allocation2 + $0x8] sm:$0xff] %v1482_v1   ;;  %v1168_v25 = vmul.f32 %v1766_v4, %v2310_v39 }
 0x364   :  { %v1768_v2 = vpop.eup %1767 }
 0x365   :  { %v1169_v26 = vmul.f32 %v1768_v2, %v2318_v41  ;;  %v1053_v42 = vpop.xlane.xlu0 %1052 }
 0x366   :  { %v1108_v27 = vmax.f32 %v1053_v42, 1e-24 }
 0x367   :  { %v1487_v53 = vpack.c.bf16 %v1169_v26, %v1168_v25  ;;  %v1055_v33 = vpop.xlane.xlu1 %1054 }
 0x368   :  { %1773 = vrsqrt.f32 %v1108_v27  ;;  %v1109_v16 = vmax.f32 %v1055_v33, 1e-24 }
 0x369   :  { %1555 = vst [vmem:[#allocation2 + $0x10] sm:$0xff] %v1487_v53  }
 0x36a   :  { %v1770_v17 = vpop.eup %1769  ;;  %1775 = vrsqrt.f32 %v1109_v16 }
 0x36b   :  { %v1170_v43 = vmul.f32 %v1770_v17, %v2332_v63 }
 0x36c   :  { %v1772_v54 = vpop.eup %1771 }
 0x36d   :  { %v1171_v11 = vmul.f32 %v1772_v54, %v2340_v24  ;;  %v1057_v28 = vpop.xlane.xlu0 %1056 }
 0x36e   :  { %v1110_v44 = vmax.f32 %v1057_v28, 1e-24 }
 0x36f   :  { %v1492_v13 = vpack.c.bf16 %v1171_v11, %v1170_v43  ;;  %v1059_v39 = vpop.xlane.xlu1 %1058 }
 0x370   :  { %1777 = vrsqrt.f32 %v1110_v44  ;;  %v1111_v41 = vmax.f32 %v1059_v39, 1e-24 }
 0x371   :  { %1556 = vst [vmem:[#allocation2 + $0x18] sm:$0xff] %v1492_v13  }
 0x372   :  { %v1774_v46 = vpop.eup %1773  ;;  %1779 = vrsqrt.f32 %v1111_v41 }
 0x373   :  { %v1172_v51 = vmul.f32 %v1774_v46, %v2354_v59 }
 0x374   :  { %v1776_v50 = vpop.eup %1775 }
 0x375   :  { %v1173_v30 = vmul.f32 %v1776_v50, %v2362_v0  ;;  %v1061_v47 = vpop.xlane.xlu0 %1060 }
 0x376   :  { %v1112_v52 = vmax.f32 %v1061_v47, 1e-24 }
 0x377   :  { %v1497_v48 = vpack.c.bf16 %v1173_v30, %v1172_v51  ;;  %v1063_v63 = vpop.xlane.xlu1 %1062 }
 0x378   :  { %1781 = vrsqrt.f32 %v1112_v52  ;;  %v1113_v24 = vmax.f32 %v1063_v63, 1e-24 }
 0x379   :  { %1557 = vst [vmem:[#allocation2 + $0x20] sm:$0xff] %v1497_v48  }
 0x37a   :  { %v1778_v49 = vpop.eup %1777  ;;  %1783 = vrsqrt.f32 %v1113_v24 }
 0x37b   :  { %v1174_v19 = vmul.f32 %v1778_v49, %v2376_v5 }
 0x37c   :  { %v1780_v35 = vpop.eup %1779 }
 0x37d   :  { %v1175_v36 = vmul.f32 %v1780_v35, %v2384_v15  ;;  %v1065_v62 = vpop.xlane.xlu0 %1064 }
 0x37e   :  { %v1114_v3 = vmax.f32 %v1065_v62, 1e-24 }
 0x37f   :  { %v1502_v61 = vpack.c.bf16 %v1175_v36, %v1174_v19  ;;  %v1067_v59 = vpop.xlane.xlu1 %1066 }
 0x380   :  { %1785 = vrsqrt.f32 %v1114_v3  ;;  %v1115_v0 = vmax.f32 %v1067_v59, 1e-24 }
 0x381   :  { %1558 = vst [vmem:[#allocation2 + $0x28] sm:$0xff] %v1502_v61  }
 0x382   :  { %v1782_v6 = vpop.eup %1781  ;;  %1787 = vrsqrt.f32 %v1115_v0 }
 0x383   :  { %v1176_v21 = vmul.f32 %v1782_v6, %v2398_v12 }
 0x384   :  { %v1784_v37 = vpop.eup %1783 }
 0x385   :  { %v1177_v7 = vmul.f32 %v1784_v37, %v2406_v40  ;;  %v1069_v38 = vpop.xlane.xlu0 %1068 }
 0x386   :  { %v1116_v1 = vmax.f32 %v1069_v38, 1e-24 }
 0x387   :  { %v1507_v4 = vpack.c.bf16 %v1177_v7, %v1176_v21  ;;  %v1071_v5 = vpop.xlane.xlu1 %1070 }
 0x388   :  { %1789 = vrsqrt.f32 %v1116_v1  ;;  %v1117_v15 = vmax.f32 %v1071_v5, 1e-24 }
 0x389   :  { %1559 = vst [vmem:[#allocation2 + $0x30] sm:$0xff] %v1507_v4  }
 0x38a   :  { %v1786_v2 = vpop.eup %1785  ;;  %1791 = vrsqrt.f32 %v1117_v15 }
 0x38b   :  { %v1178_v26 = vmul.f32 %v1786_v2, %v2420_v14 }
 0x38c   :  { %v1788_v25 = vpop.eup %1787 }
 0x38d   :  { %v1179_v42 = vmul.f32 %v1788_v25, %v2428_v23  ;;  %v1073_v27 = vpop.xlane.xlu0 %1072 }
 0x38e   :  { %v1118_v53 = vmax.f32 %v1073_v27, 1e-24 }
 0x38f   :  { %v1512_v33 = vpack.c.bf16 %v1179_v42, %v1178_v26  ;;  %v1075_v12 = vpop.xlane.xlu1 %1074 }
 0x390   :  { %1793 = vrsqrt.f32 %v1118_v53  ;;  %v1119_v40 = vmax.f32 %v1075_v12, 1e-24 }
 0x391   :  { %1560 = vst [vmem:[#allocation2 + $0x38] sm:$0xff] %v1512_v33  }
 0x392   :  { %v1790_v16 = vpop.eup %1789  ;;  %1795 = vrsqrt.f32 %v1119_v40 }
 0x393   :  { %v1180_v54 = vmul.f32 %v1790_v16, %v2442_v20 }
 0x394   :  { %v1792_v17 = vpop.eup %1791 }
 0x395   :  { %v1181_v43 = vmul.f32 %v1792_v17, %v2450_v60  ;;  %v1077_v11 = vpop.xlane.xlu0 %1076 }
 0x396   :  { %v1120_v28 = vmax.f32 %v1077_v11, 1e-24 }
 0x397   :  { %v1517_v44 = vpack.c.bf16 %v1181_v43, %v1180_v54  ;;  %v1079_v14 = vpop.xlane.xlu1 %1078 }
 0x398   :  { %1797 = vrsqrt.f32 %v1120_v28  ;;  %v1121_v23 = vmax.f32 %v1079_v14, 1e-24 }
 0x399   :  { %1561 = vst [vmem:[#allocation2 + $0x40] sm:$0xff] %v1517_v44  }
 0x39a   :  { %v1794_v13 = vpop.eup %1793  ;;  %1799 = vrsqrt.f32 %v1121_v23 }
 0x39b   :  { %v1182_v41 = vmul.f32 %v1794_v13, %v2464_v22 }
 0x39c   :  { %v1796_v39 = vpop.eup %1795 }
 0x39d   :  { %v1183_v46 = vmul.f32 %v1796_v39, %v2472_v10  ;;  %v1081_v50 = vpop.xlane.xlu0 %1080 }
 0x39e   :  { %v1122_v51 = vmax.f32 %v1081_v50, 1e-24 }
 0x39f   :  { %v1522_v30 = vpack.c.bf16 %v1183_v46, %v1182_v41  ;;  %v1083_v20 = vpop.xlane.xlu1 %1082 }
 0x3a0   :  { %1801 = vrsqrt.f32 %v1122_v51  ;;  %v1123_v60 = vmax.f32 %v1083_v20, 1e-24 }
 0x3a1   :  { %1562 = vst [vmem:[#allocation2 + $0x48] sm:$0xff] %v1522_v30  }
 0x3a2   :  { %v1798_v47 = vpop.eup %1797  ;;  %1803 = vrsqrt.f32 %v1123_v60 }
 0x3a3   :  { %v1184_v48 = vmul.f32 %v1798_v47, %v2488_v18 }
 0x3a4   :  { %v1800_v52 = vpop.eup %1799 }
 0x3a5   :  { %v1185_v63 = vmul.f32 %v1800_v52, %v2498_v45  ;;  %v1085_v24 = vpop.xlane.xlu0 %1084 }
 0x3a6   :  { %v1124_v49 = vmax.f32 %v1085_v24, 1e-24 }
 0x3a7   :  { %v1527_v35 = vpack.c.bf16 %v1185_v63, %v1184_v48  ;;  %v1087_v22 = vpop.xlane.xlu1 %1086 }
 0x3a8   :  { %1805 = vrsqrt.f32 %v1124_v49  ;;  %v1125_v10 = vmax.f32 %v1087_v22, 1e-24 }
 0x3a9   :  { %1563 = vst [vmem:[#allocation2 + $0x50] sm:$0xff] %v1527_v35  }
 0x3aa   :  { %v1802_v19 = vpop.eup %1801  ;;  %1807 = vrsqrt.f32 %v1125_v10 }
 0x3ab   :  { %v1186_v62 = vmul.f32 %v1802_v19, %v2514_v55 }
 0x3ac   :  { %v1804_v36 = vpop.eup %1803 }
 0x3ad   :  { %v1187_v3 = vmul.f32 %v1804_v36, %v2524_v56  ;;  %v1089_v61 = vpop.xlane.xlu0 %1088 }
 0x3ae   :  { %v1126_v59 = vmax.f32 %v1089_v61, 1e-24 }
 0x3af   :  { %v1532_v0 = vpack.c.bf16 %v1187_v3, %v1186_v62  ;;  %v1091_v18 = vpop.xlane.xlu1 %1090 }
 0x3b0   :  { %1809 = vrsqrt.f32 %v1126_v59  ;;  %v1127_v45 = vmax.f32 %v1091_v18, 1e-24 }
 0x3b1   :  { %1564 = vst [vmem:[#allocation2 + $0x58] sm:$0xff] %v1532_v0  }
 0x3b2   :  { %v1806_v6 = vpop.eup %1805  ;;  %1811 = vrsqrt.f32 %v1127_v45 }
 0x3b3   :  { %v1188_v21 = vmul.f32 %v1806_v6, %v2540_v8 }
 0x3b4   :  { %v1808_v37 = vpop.eup %1807 }
 0x3b5   :  { %v1189_v7 = vmul.f32 %v1808_v37, %v2550_v9  ;;  %v1093_v38 = vpop.xlane.xlu0 %1092 }
 0x3b6   :  { %v1128_v1 = vmax.f32 %v1093_v38, 1e-24 }
 0x3b7   :  { %v1537_v4 = vpack.c.bf16 %v1189_v7, %v1188_v21  ;;  %v1095_v55 = vpop.xlane.xlu1 %1094 }
 0x3b8   :  { %1813 = vrsqrt.f32 %v1128_v1  ;;  %v1129_v56 = vmax.f32 %v1095_v55, 1e-24 }
 0x3b9   :  { %1565 = vst [vmem:[#allocation2 + $0x60] sm:$0xff] %v1537_v4  }
 0x3ba   :  { %v1810_v5 = vpop.eup %1809  ;;  %1815 = vrsqrt.f32 %v1129_v56 }
 0x3bb   :  { %v1190_v2 = vmul.f32 %v1810_v5, %v2566_v34 }
 0x3bc   :  { %v1812_v15 = vpop.eup %1811 }
 0x3bd   :  { %v1191_v25 = vmul.f32 %v1812_v15, %v2576_v29  ;;  %v1097_v26 = vpop.xlane.xlu0 %1096 }
 0x3be   :  { %v1130_v42 = vmax.f32 %v1097_v26, 1e-24 }
 0x3bf   :  { %v1542_v27 = vpack.c.bf16 %v1191_v25, %v1190_v2  ;;  %v1099_v8 = vpop.xlane.xlu1 %1098 }
 0x3c0   :  { %1817 = vrsqrt.f32 %v1130_v42  ;;  %v1131_v9 = vmax.f32 %v1099_v8, 1e-24 }
 0x3c1   :  { %1566 = vst [vmem:[#allocation2 + $0x68] sm:$0xff] %v1542_v27  }
 0x3c2   :  { %v1814_v53 = vpop.eup %1813  ;;  %1819 = vrsqrt.f32 %v1131_v9 }
 0x3c3   :  { %v1192_v12 = vmul.f32 %v1814_v53, %v2592_v57 }
 0x3c4   :  { %v1816_v33 = vpop.eup %1815 }
 0x3c5   :  { %v1193_v40 = vmul.f32 %v1816_v33, %v2602_v58 }
 0x3c7   :  { %v1547_v16 = vpack.c.bf16 %v1193_v40, %v1192_v12 }
 0x3c9   :  { %1567 = vst [vmem:[#allocation2 + $0x70] sm:$0xff] %v1547_v16  }
 0x3ca   :  { %v1818_v17 = vpop.eup %1817 }
 0x3cb   :  { %v1194_v29 = vmul.f32 %v1818_v17, %v2618_v31 }
 0x3cc   :  { %v1820_v34 = vpop.eup %1819 }
 0x3cd   :  { %v1195_v54 = vmul.f32 %v1820_v34, %v2628_v32 }
 0x3cf   :  { %v1552_v43 = vpack.c.bf16 %v1195_v54, %v1194_v29 }
 0x3d1   :  { %1568 = vst [vmem:[#allocation2 + $0x78] sm:$0xff] %v1552_v43  }
 0x3d2   :  { %1844 = shalt.err (!%p1841_p4)
}
 0x3d3   :  { %s1845_s25 = scalar_lea.hbm %s2686_s8, 2048 }
 0x3d4   :  { %p1846_p5 = scmp.ne.s32.totalorder %s2686_s8, %s1845_s25  ;;  %p1849_p6 = scmp.lt.u32.totalorder %s1845_s25, %s2686_s8 }
 0x3d6   :  { %p1851_p7 = pnand %p1849_p6, %p1846_p5 }
 0x3d8   :  { %1854 = shalt.err (!%p1851_p7)
}
 0x3d9   :  { %s1859_s30 = smov 64   ;;  %s1860_s9 = smov 4  }
 0x3da   :  { %1369 = dma.vmem_to_hbm [thread:$0]  %s1364_s7, 2048, %s2686_s8, [#allocation3], %s1859_s30, %s1859_s30, %s1860_s9  }
 0x3db   :  { %1855 = dma.done.wait [#allocation3], 2048  }
 0x3dc   :  { %1856 = vsyncadd [#allocation3], 4294965248 }
 0x3dd   :  { %1375 = vsyncpa [#allocation3], 1 }

</bundles_post_ra>
